<compile_context>
chip_gen: v6e
topology: v6e:2x2x1
jax: 0.10.0
libtpu: 0.0.40
codegen_flags: <defaults>
</compile_context>

<pallas_src>
import functools

import numpy as np
import jax
import jax.numpy as jnp
from jax import lax
from jax.experimental import pallas as pl
from jax.experimental.pallas import tpu as pltpu

NEG_SLOPE = 0.01  # torch.nn.LeakyReLU default negative_slope

# Network dimensions (match the torch module / CIFAR input).
CONV_K = 5
C_IN, C1, C2 = 3, 6, 16
H_IN = W_IN = 32
FC1, FC2, NCLASS = 120, 84, 10


def _leaky(x):
    return jnp.where(x > 0, x, NEG_SLOPE * x)


# ----------------------- fused conv + pool stage --------------------------- #

def _conv_pool_kernel(x_ref, wb_ref, b_ref, rsel_ref, csel_ref, o_ref, *, K, OH):
    """Per-image: conv (K row-banded matmuls) + bias + LeakyReLU + 2x2 maxpool."""
    # conv:  y[oh, ow*Cout+co] = sum_kh  x[kh+oh, :] @ WB[kh]
    acc = jnp.dot(x_ref[0, 0:OH, :], wb_ref[0],
                  preferred_element_type=jnp.float32)
    for kh in range(1, K):
        acc += jnp.dot(x_ref[0, kh:kh + OH, :], wb_ref[kh],
                       preferred_element_type=jnp.float32)
    y = _leaky(acc + b_ref[...])                                   # (OH, OW*Cout)

    # fused 2x2 stride-2 maxpool: pick the 4 window taps with exact 0/1
    # selection matmuls (rows, then column groups) and take their max.
    r0 = jnp.dot(rsel_ref[0], y, preferred_element_type=jnp.float32)   # rows 2*po
    r1 = jnp.dot(rsel_ref[1], y, preferred_element_type=jnp.float32)   # rows 2*po+1
    p = jnp.maximum(
        jnp.maximum(jnp.dot(r0, csel_ref[0], preferred_element_type=jnp.float32),
                    jnp.dot(r0, csel_ref[1], preferred_element_type=jnp.float32)),
        jnp.maximum(jnp.dot(r1, csel_ref[0], preferred_element_type=jnp.float32),
                    jnp.dot(r1, csel_ref[1], preferred_element_type=jnp.float32)))
    o_ref[0] = p.astype(o_ref.dtype)                               # (POH, POW*Cout)


def conv_pool_stage(x, wb, b_row, rsel, csel):
    """x: (N, H, W*Cin)  ->  (N, POH, POW*Cout); one grid step per image."""
    N, H, WC = x.shape
    K, WC2, OWC = wb.shape
    assert WC == WC2, (WC, WC2)
    _, POH, OH = rsel.shape
    _, OWC2, POWC = csel.shape
    assert OWC == OWC2, (OWC, OWC2)

    kernel = functools.partial(_conv_pool_kernel, K=K, OH=OH)
    return pl.pallas_call(
        kernel,
        out_shape=jax.ShapeDtypeStruct((N, POH, POWC), jnp.float32),
        grid=(N,),
        in_specs=[
            pl.BlockSpec((1, H, WC), lambda n: (n, 0, 0)),        # per-image input
            pl.BlockSpec((K, WC, OWC), lambda n: (0, 0, 0)),      # VMEM-resident weights
            pl.BlockSpec((1, OWC), lambda n: (0, 0)),             # bias row
            pl.BlockSpec((2, POH, OH), lambda n: (0, 0, 0)),      # pool row selectors
            pl.BlockSpec((2, OWC, POWC), lambda n: (0, 0, 0)),    # pool col selectors
        ],
        out_specs=pl.BlockSpec((1, POH, POWC), lambda n: (n, 0, 0)),
        compiler_params=pltpu.CompilerParams(
            dimension_semantics=("parallel",)),
    )(x, wb, b_row, rsel, csel)


# ------------------------- fused fc1+fc2+fc3 stage ------------------------- #

def _fc_kernel(x_ref, w1_ref, b1_ref, w2_ref, b2_ref, w3_ref, b3_ref, o_ref):
    h = x_ref[...]
    h = _leaky(jnp.dot(h, w1_ref[...], preferred_element_type=jnp.float32) + b1_ref[...])
    h = _leaky(jnp.dot(h, w2_ref[...], preferred_element_type=jnp.float32) + b2_ref[...])
    o_ref[...] = (jnp.dot(h, w3_ref[...], preferred_element_type=jnp.float32)
                  + b3_ref[...]).astype(o_ref.dtype)


def _batch_tile(n):
    for t in (1024, 512, 256, 128, 64, 32, 16, 8):
        if n % t == 0:
            return t
    return n  # small / odd batches: single block


def fc_stack(x, w1, b1, w2, b2, w3, b3):
    N, D = x.shape
    TM = _batch_tile(N)
    return pl.pallas_call(
        _fc_kernel,
        out_shape=jax.ShapeDtypeStruct((N, w3.shape[1]), jnp.float32),
        grid=(N // TM,),
        in_specs=[
            pl.BlockSpec((TM, D), lambda i: (i, 0)),
            pl.BlockSpec(w1.shape, lambda i: (0, 0)),   # all weights stay VMEM-resident
            pl.BlockSpec(b1.shape, lambda i: (0, 0)),
            pl.BlockSpec(w2.shape, lambda i: (0, 0)),
            pl.BlockSpec(b2.shape, lambda i: (0, 0)),
            pl.BlockSpec(w3.shape, lambda i: (0, 0)),
            pl.BlockSpec(b3.shape, lambda i: (0, 0)),
        ],
        out_specs=pl.BlockSpec((TM, w3.shape[1]), lambda i: (i, 0)),
        compiler_params=pltpu.CompilerParams(
            dimension_semantics=("parallel",)),
    )(x, w1, b1, w2, b2, w3, b3)


# ------------------- host-side (one-time) parameter prep ------------------- #

def _banded_conv_weights(w, W):
    """w: (Cout, Cin, K, K) torch layout -> (K, W*Cin, OW*Cout) banded matrices."""
    w = np.asarray(w, np.float32)
    Cout, Cin, K, _ = w.shape
    OW = W - K + 1
    wb = np.zeros((K, W * Cin, OW * Cout), np.float32)
    for kh in range(K):
        for kw in range(K):
            blk = w[:, :, kh, kw].T                      # (Cin, Cout)
            for ow in range(OW):
                r = (ow + kw) * Cin
                c = ow * Cout
                wb[kh, r:r + Cin, c:c + Cout] = blk
    return wb


def _pool_selectors(OH, OW, Cout):
    """Exact 0/1 selection matrices for a fused 2x2 stride-2 maxpool."""
    POH, POW = OH // 2, OW // 2
    rsel = np.zeros((2, POH, OH), np.float32)
    csel = np.zeros((2, OW * Cout, POW * Cout), np.float32)
    for d in range(2):
        for po in range(POH):
            rsel[d, po, 2 * po + d] = 1.0
        for pw in range(POW):
            for co in range(Cout):
                csel[d, (2 * pw + d) * Cout + co, pw * Cout + co] = 1.0
    return rsel, csel


def prepare_params(params):
    """One-time transform of torch-layout params into kernel operands (outside jit)."""
    p = {k: np.asarray(v, np.float32) for k, v in params.items()}

    OH1, OW1 = H_IN - CONV_K + 1, W_IN - CONV_K + 1          # 28, 28
    PH1, PW1 = OH1 // 2, OW1 // 2                            # 14, 14
    OH2, OW2 = PH1 - CONV_K + 1, PW1 - CONV_K + 1            # 10, 10
    PH2, PW2 = OH2 // 2, OW2 // 2                            # 5, 5

    rsel1, csel1 = _pool_selectors(OH1, OW1, C1)
    rsel2, csel2 = _pool_selectors(OH2, OW2, C2)

    # fc1: fold torch's NCHW view(-1,400) order (c,h,w) into a column permutation
    # so the kernel consumes our (h, w, c) activation layout directly.
    w1 = p["fc1_w"].reshape(FC1, C2, PH2, PW2)
    w1_eff = np.transpose(w1, (2, 3, 1, 0)).reshape(PH2 * PW2 * C2, FC1)

    prep = {
        "c1_wb": _banded_conv_weights(p["conv1_w"], W_IN),
        "c1_b": np.tile(p["conv1_b"], OW1)[None, :],
        "c1_rsel": rsel1, "c1_csel": csel1,
        "c2_wb": _banded_conv_weights(p["conv2_w"], PW1),
        "c2_b": np.tile(p["conv2_b"], OW2)[None, :],
        "c2_rsel": rsel2, "c2_csel": csel2,
        "fc1_w": w1_eff, "fc1_b": p["fc1_b"][None, :],
        "fc2_w": np.ascontiguousarray(p["fc2_w"].T), "fc2_b": p["fc2_b"][None, :],
        "fc3_w": np.ascontiguousarray(p["fc3_w"].T), "fc3_b": p["fc3_b"][None, :],
    }
    return {k: jnp.asarray(v) for k, v in prep.items()}


# --------------------------- params & forward ------------------------------ #

def init_params(key):
    """Uniform(-1/sqrt(fan_in), 1/sqrt(fan_in)) like torch's default init."""
    ks = jax.random.split(key, 10)

    def u(k, shape, fan_in):
        bound = 1.0 / float(fan_in) ** 0.5
        return jax.random.uniform(k, shape, jnp.float32, -bound, bound)

    return {
        "conv1_w": u(ks[0], (C1, C_IN, CONV_K, CONV_K), C_IN * CONV_K ** 2),
        "conv1_b": u(ks[1], (C1,), C_IN * CONV_K ** 2),
        "conv2_w": u(ks[2], (C2, C1, CONV_K, CONV_K), C1 * CONV_K ** 2),
        "conv2_b": u(ks[3], (C2,), C1 * CONV_K ** 2),
        "fc1_w": u(ks[4], (FC1, C2 * CONV_K ** 2), C2 * CONV_K ** 2),
        "fc1_b": u(ks[5], (FC1,), C2 * CONV_K ** 2),
        "fc2_w": u(ks[6], (FC2, FC1), FC1),
        "fc2_b": u(ks[7], (FC2,), FC1),
        "fc3_w": u(ks[8], (NCLASS, FC2), FC2),
        "fc3_b": u(ks[9], (NCLASS,), FC2),
    }


@jax.jit
def net_forward(prep, x):
    # x: (N, 3, 32, 32) NCHW float32, like torch.  Single transpose to the
    # channel-minor (N, H, W*C) layout; everything downstream stays in it.
    N = x.shape[0]
    x = jnp.transpose(x, (0, 2, 3, 1)).reshape(N, H_IN, W_IN * C_IN)
    x = conv_pool_stage(x, prep["c1_wb"], prep["c1_b"],
                        prep["c1_rsel"], prep["c1_csel"])          # (N, 14, 14*6)
    x = conv_pool_stage(x, prep["c2_wb"], prep["c2_b"],
                        prep["c2_rsel"], prep["c2_csel"])          # (N, 5, 5*16)
    x = x.reshape(N, -1)      # (N, 400) in (h, w, c) order; fc1_w already permuted
    return fc_stack(x, prep["fc1_w"], prep["fc1_b"],
                    prep["fc2_w"], prep["fc2_b"],
                    prep["fc3_w"], prep["fc3_b"])                  # (N, 10)


# ------------------------- pure-JAX reference model ------------------------ #

def reference_forward(params, x):
    dn = ("NCHW", "OIHW", "NCHW")

    def conv(x, w, b):
        y = lax.conv_general_dilated(x, w, (1, 1), "VALID", dimension_numbers=dn,
                                     precision=lax.Precision.HIGHEST)
        return y + b[None, :, None, None]

    def pool(x):
        return lax.reduce_window(x, -jnp.inf, lax.max,
                                 (1, 1, 2, 2), (1, 1, 2, 2), "VALID")

    x = pool(_leaky(conv(x, params["conv1_w"], params["conv1_b"])))
    x = pool(_leaky(conv(x, params["conv2_w"], params["conv2_b"])))
    x = x.reshape(x.shape[0], -1)
    x = _leaky(jnp.dot(x, params["fc1_w"].T, precision=lax.Precision.HIGHEST)
               + params["fc1_b"])
    x = _leaky(jnp.dot(x, params["fc2_w"].T, precision=lax.Precision.HIGHEST)
               + params["fc2_b"])
    return jnp.dot(x, params["fc3_w"].T, precision=lax.Precision.HIGHEST) + params["fc3_b"]


if __name__ == "__main__":
    key = jax.random.PRNGKey(0)
    pkey, xkey = jax.random.split(key)
    params = init_params(pkey)
    prep = prepare_params(params)

    x = jax.random.normal(xkey, (2, 3, 32, 32), jnp.float32)   # batch=2, CIFAR-size

    out = net_forward(prep, x)
    jax.block_until_ready(out)
    assert out.shape == (2, NCLASS), out.shape
    assert bool(jnp.all(jnp.isfinite(out)))

    ref = reference_forward(params, x)
    err = float(jnp.max(jnp.abs(out - ref)))
    assert err < 1e-2, f"max |pallas - reference| = {err}"
    print("KERNEL_OK")
</pallas_src>

<mosaic_0001>
module attributes {stable_mosaic.version = 11 : i64} {
  func.func @_conv_pool_kernel(%arg0: i32, %arg1: memref<1x32x96xf32, #tpu.memory_space<vmem>>, %arg2: memref<5x96x168xf32, #tpu.memory_space<vmem>>, %arg3: memref<1x168xf32, #tpu.memory_space<vmem>>, %arg4: memref<2x14x28xf32, #tpu.memory_space<vmem>>, %arg5: memref<2x168x84xf32, #tpu.memory_space<vmem>>, %arg6: memref<1x14x84xf32, #tpu.memory_space<vmem>>) attributes {dimension_semantics = [#tpu.dimension_semantics<parallel>], iteration_bounds = array<i64: 2>, scalar_prefetch = 0 : i64, scratch_operands = 0 : i64, tpu.core_type = #tpu.core_type<tc>, window_params = [{transform_indices = @transform_0, window_bounds = array<i64: 1, 32, 96>}, {pipeline_mode = #tpu.pipeline_mode<synchronous>, transform_indices = @transform_1, window_bounds = array<i64: 5, 96, 168>}, {pipeline_mode = #tpu.pipeline_mode<synchronous>, transform_indices = @transform_2, window_bounds = array<i64: 1, 168>}, {pipeline_mode = #tpu.pipeline_mode<synchronous>, transform_indices = @transform_3, window_bounds = array<i64: 2, 14, 28>}, {pipeline_mode = #tpu.pipeline_mode<synchronous>, transform_indices = @transform_4, window_bounds = array<i64: 2, 168, 84>}, {transform_indices = @transform_5, window_bounds = array<i64: 1, 14, 84>}]} {
    %c0 = arith.constant 0 : index
    %c0_0 = arith.constant 0 : index
    %c0_1 = arith.constant 0 : index
    %0 = vector.load %arg1[%c0, %c0_0, %c0_1] : memref<1x32x96xf32, #tpu.memory_space<vmem>>, vector<1x28x96xf32>
    %1 = vector.shape_cast %0 : vector<1x28x96xf32> to vector<28x96xf32>
    %c0_2 = arith.constant 0 : index
    %c0_3 = arith.constant 0 : index
    %c0_4 = arith.constant 0 : index
    %2 = vector.load %arg2[%c0_2, %c0_3, %c0_4] : memref<5x96x168xf32, #tpu.memory_space<vmem>>, vector<1x96x168xf32>
    %3 = vector.shape_cast %2 : vector<1x96x168xf32> to vector<96x168xf32>
    %cst = arith.constant dense<0.000000e+00> : vector<28x168xf32>
    %4 = tpu.matmul %1, %3, %cst {dimension_numbers = #tpu.dot_dimension_numbers<[1], [0], [0], [1], [0, 0, 1, 1], [], []>} : vector<28x96xf32>, vector<96x168xf32>, vector<28x168xf32> -> vector<28x168xf32>
    %c0_5 = arith.constant 0 : index
    %c1 = arith.constant 1 : index
    %c0_6 = arith.constant 0 : index
    %5 = vector.load %arg1[%c0_5, %c1, %c0_6] : memref<1x32x96xf32, #tpu.memory_space<vmem>>, vector<1x28x96xf32>
    %6 = vector.shape_cast %5 : vector<1x28x96xf32> to vector<28x96xf32>
    %c1_7 = arith.constant 1 : index
    %c0_8 = arith.constant 0 : index
    %c0_9 = arith.constant 0 : index
    %7 = vector.load %arg2[%c1_7, %c0_8, %c0_9] : memref<5x96x168xf32, #tpu.memory_space<vmem>>, vector<1x96x168xf32>
    %8 = vector.shape_cast %7 : vector<1x96x168xf32> to vector<96x168xf32>
    %cst_10 = arith.constant dense<0.000000e+00> : vector<28x168xf32>
    %9 = tpu.matmul %6, %8, %cst_10 {dimension_numbers = #tpu.dot_dimension_numbers<[1], [0], [0], [1], [0, 0, 1, 1], [], []>} : vector<28x96xf32>, vector<96x168xf32>, vector<28x168xf32> -> vector<28x168xf32>
    %10 = arith.addf %4, %9 : vector<28x168xf32>
    %c0_11 = arith.constant 0 : index
    %c2 = arith.constant 2 : index
    %c0_12 = arith.constant 0 : index
    %11 = vector.load %arg1[%c0_11, %c2, %c0_12] : memref<1x32x96xf32, #tpu.memory_space<vmem>>, vector<1x28x96xf32>
    %12 = vector.shape_cast %11 : vector<1x28x96xf32> to vector<28x96xf32>
    %c2_13 = arith.constant 2 : index
    %c0_14 = arith.constant 0 : index
    %c0_15 = arith.constant 0 : index
    %13 = vector.load %arg2[%c2_13, %c0_14, %c0_15] : memref<5x96x168xf32, #tpu.memory_space<vmem>>, vector<1x96x168xf32>
    %14 = vector.shape_cast %13 : vector<1x96x168xf32> to vector<96x168xf32>
    %cst_16 = arith.constant dense<0.000000e+00> : vector<28x168xf32>
    %15 = tpu.matmul %12, %14, %cst_16 {dimension_numbers = #tpu.dot_dimension_numbers<[1], [0], [0], [1], [0, 0, 1, 1], [], []>} : vector<28x96xf32>, vector<96x168xf32>, vector<28x168xf32> -> vector<28x168xf32>
    %16 = arith.addf %10, %15 : vector<28x168xf32>
    %c0_17 = arith.constant 0 : index
    %c3 = arith.constant 3 : index
    %c0_18 = arith.constant 0 : index
    %17 = vector.load %arg1[%c0_17, %c3, %c0_18] : memref<1x32x96xf32, #tpu.memory_space<vmem>>, vector<1x28x96xf32>
    %18 = vector.shape_cast %17 : vector<1x28x96xf32> to vector<28x96xf32>
    %c3_19 = arith.constant 3 : index
    %c0_20 = arith.constant 0 : index
    %c0_21 = arith.constant 0 : index
    %19 = vector.load %arg2[%c3_19, %c0_20, %c0_21] : memref<5x96x168xf32, #tpu.memory_space<vmem>>, vector<1x96x168xf32>
    %20 = vector.shape_cast %19 : vector<1x96x168xf32> to vector<96x168xf32>
    %cst_22 = arith.constant dense<0.000000e+00> : vector<28x168xf32>
    %21 = tpu.matmul %18, %20, %cst_22 {dimension_numbers = #tpu.dot_dimension_numbers<[1], [0], [0], [1], [0, 0, 1, 1], [], []>} : vector<28x96xf32>, vector<96x168xf32>, vector<28x168xf32> -> vector<28x168xf32>
    %22 = arith.addf %16, %21 : vector<28x168xf32>
    %c0_23 = arith.constant 0 : index
    %c4 = arith.constant 4 : index
    %c0_24 = arith.constant 0 : index
    %23 = vector.load %arg1[%c0_23, %c4, %c0_24] : memref<1x32x96xf32, #tpu.memory_space<vmem>>, vector<1x28x96xf32>
    %24 = vector.shape_cast %23 : vector<1x28x96xf32> to vector<28x96xf32>
    %c4_25 = arith.constant 4 : index
    %c0_26 = arith.constant 0 : index
    %c0_27 = arith.constant 0 : index
    %25 = vector.load %arg2[%c4_25, %c0_26, %c0_27] : memref<5x96x168xf32, #tpu.memory_space<vmem>>, vector<1x96x168xf32>
    %26 = vector.shape_cast %25 : vector<1x96x168xf32> to vector<96x168xf32>
    %cst_28 = arith.constant dense<0.000000e+00> : vector<28x168xf32>
    %27 = tpu.matmul %24, %26, %cst_28 {dimension_numbers = #tpu.dot_dimension_numbers<[1], [0], [0], [1], [0, 0, 1, 1], [], []>} : vector<28x96xf32>, vector<96x168xf32>, vector<28x168xf32> -> vector<28x168xf32>
    %28 = arith.addf %22, %27 : vector<28x168xf32>
    %c0_29 = arith.constant 0 : index
    %c0_30 = arith.constant 0 : index
    %29 = vector.load %arg3[%c0_29, %c0_30] : memref<1x168xf32, #tpu.memory_space<vmem>>, vector<1x168xf32>
    %30 = vector.broadcast %29 : vector<1x168xf32> to vector<28x168xf32>
    %31 = arith.addf %28, %30 : vector<28x168xf32>
    %cst_31 = arith.constant 0.000000e+00 : f32
    %32 = vector.broadcast %cst_31 : f32 to vector<28x168xf32>
    %33 = arith.cmpf ogt, %31, %32 : vector<28x168xf32>
    %cst_32 = arith.constant 0.00999999977 : f32
    %34 = vector.broadcast %cst_32 : f32 to vector<28x168xf32>
    %35 = arith.mulf %34, %31 : vector<28x168xf32>
    %36 = arith.select %33, %31, %35 : vector<28x168xi1>, vector<28x168xf32>
    %c0_33 = arith.constant 0 : index
    %c0_34 = arith.constant 0 : index
    %c0_35 = arith.constant 0 : index
    %37 = vector.load %arg4[%c0_33, %c0_34, %c0_35] : memref<2x14x28xf32, #tpu.memory_space<vmem>>, vector<1x14x28xf32>
    %38 = vector.shape_cast %37 : vector<1x14x28xf32> to vector<14x28xf32>
    %cst_36 = arith.constant dense<0.000000e+00> : vector<14x168xf32>
    %39 = tpu.matmul %38, %36, %cst_36 {dimension_numbers = #tpu.dot_dimension_numbers<[1], [0], [0], [1], [0, 0, 1, 1], [], []>} : vector<14x28xf32>, vector<28x168xf32>, vector<14x168xf32> -> vector<14x168xf32>
    %c1_37 = arith.constant 1 : index
    %c0_38 = arith.constant 0 : index
    %c0_39 = arith.constant 0 : index
    %40 = vector.load %arg4[%c1_37, %c0_38, %c0_39] : memref<2x14x28xf32, #tpu.memory_space<vmem>>, vector<1x14x28xf32>
    %41 = vector.shape_cast %40 : vector<1x14x28xf32> to vector<14x28xf32>
    %cst_40 = arith.constant dense<0.000000e+00> : vector<14x168xf32>
    %42 = tpu.matmul %41, %36, %cst_40 {dimension_numbers = #tpu.dot_dimension_numbers<[1], [0], [0], [1], [0, 0, 1, 1], [], []>} : vector<14x28xf32>, vector<28x168xf32>, vector<14x168xf32> -> vector<14x168xf32>
    %c0_41 = arith.constant 0 : index
    %c0_42 = arith.constant 0 : index
    %c0_43 = arith.constant 0 : index
    %43 = vector.load %arg5[%c0_41, %c0_42, %c0_43] : memref<2x168x84xf32, #tpu.memory_space<vmem>>, vector<1x168x84xf32>
    %44 = vector.shape_cast %43 : vector<1x168x84xf32> to vector<168x84xf32>
    %cst_44 = arith.constant dense<0.000000e+00> : vector<14x84xf32>
    %45 = tpu.matmul %39, %44, %cst_44 {dimension_numbers = #tpu.dot_dimension_numbers<[1], [0], [0], [1], [0, 0, 1, 1], [], []>} : vector<14x168xf32>, vector<168x84xf32>, vector<14x84xf32> -> vector<14x84xf32>
    %c1_45 = arith.constant 1 : index
    %c0_46 = arith.constant 0 : index
    %c0_47 = arith.constant 0 : index
    %46 = vector.load %arg5[%c1_45, %c0_46, %c0_47] : memref<2x168x84xf32, #tpu.memory_space<vmem>>, vector<1x168x84xf32>
    %47 = vector.shape_cast %46 : vector<1x168x84xf32> to vector<168x84xf32>
    %cst_48 = arith.constant dense<0.000000e+00> : vector<14x84xf32>
    %48 = tpu.matmul %39, %47, %cst_48 {dimension_numbers = #tpu.dot_dimension_numbers<[1], [0], [0], [1], [0, 0, 1, 1], [], []>} : vector<14x168xf32>, vector<168x84xf32>, vector<14x84xf32> -> vector<14x84xf32>
    %49 = arith.maximumf %45, %48 : vector<14x84xf32>
    %c0_49 = arith.constant 0 : index
    %c0_50 = arith.constant 0 : index
    %c0_51 = arith.constant 0 : index
    %50 = vector.load %arg5[%c0_49, %c0_50, %c0_51] : memref<2x168x84xf32, #tpu.memory_space<vmem>>, vector<1x168x84xf32>
    %51 = vector.shape_cast %50 : vector<1x168x84xf32> to vector<168x84xf32>
    %cst_52 = arith.constant dense<0.000000e+00> : vector<14x84xf32>
    %52 = tpu.matmul %42, %51, %cst_52 {dimension_numbers = #tpu.dot_dimension_numbers<[1], [0], [0], [1], [0, 0, 1, 1], [], []>} : vector<14x168xf32>, vector<168x84xf32>, vector<14x84xf32> -> vector<14x84xf32>
    %c1_53 = arith.constant 1 : index
    %c0_54 = arith.constant 0 : index
    %c0_55 = arith.constant 0 : index
    %53 = vector.load %arg5[%c1_53, %c0_54, %c0_55] : memref<2x168x84xf32, #tpu.memory_space<vmem>>, vector<1x168x84xf32>
    %54 = vector.shape_cast %53 : vector<1x168x84xf32> to vector<168x84xf32>
    %cst_56 = arith.constant dense<0.000000e+00> : vector<14x84xf32>
    %55 = tpu.matmul %42, %54, %cst_56 {dimension_numbers = #tpu.dot_dimension_numbers<[1], [0], [0], [1], [0, 0, 1, 1], [], []>} : vector<14x168xf32>, vector<168x84xf32>, vector<14x84xf32> -> vector<14x84xf32>
    %56 = arith.maximumf %52, %55 : vector<14x84xf32>
    %57 = arith.maximumf %49, %56 : vector<14x84xf32>
    %c0_57 = arith.constant 0 : index
    %c0_58 = arith.constant 0 : index
    %c0_59 = arith.constant 0 : index
    %58 = vector.load %arg6[%c0_57, %c0_58, %c0_59] : memref<1x14x84xf32, #tpu.memory_space<vmem>>, vector<1x14x84xf32>
    %59 = vector.shape_cast %58 : vector<1x14x84xf32> to vector<14x84xf32>
    %60 = vector.shape_cast %57 : vector<14x84xf32> to vector<1x14x84xf32>
    tpu.vector_store %arg6[%c0_57, %c0_58, %c0_59], %60 {strides = array<i32>} : memref<1x14x84xf32, #tpu.memory_space<vmem>>, vector<1x14x84xf32>,
    return
  }
  func.func @transform_0(%arg0: i32) -> (i32, i32, i32) {
    %c0_i32 = arith.constant 0 : i32
    %c0_i32_0 = arith.constant 0 : i32
    %c0_i32_1 = arith.constant 0 : i32
    return %arg0, %c0_i32, %c0_i32_0 : i32, i32, i32
  }
  func.func @transform_1(%arg0: i32) -> (i32, i32, i32) {
    %c0_i32 = arith.constant 0 : i32
    %c0_i32_0 = arith.constant 0 : i32
    %c0_i32_1 = arith.constant 0 : i32
    %c0_i32_2 = arith.constant 0 : i32
    return %c0_i32, %c0_i32_0, %c0_i32_1 : i32, i32, i32
  }
  func.func @transform_2(%arg0: i32) -> (i32, i32) {
    %c0_i32 = arith.constant 0 : i32
    %c0_i32_0 = arith.constant 0 : i32
    %c0_i32_1 = arith.constant 0 : i32
    return %c0_i32, %c0_i32_0 : i32, i32
  }
  func.func @transform_3(%arg0: i32) -> (i32, i32, i32) {
    %c0_i32 = arith.constant 0 : i32
    %c0_i32_0 = arith.constant 0 : i32
    %c0_i32_1 = arith.constant 0 : i32
    %c0_i32_2 = arith.constant 0 : i32
    return %c0_i32, %c0_i32_0, %c0_i32_1 : i32, i32, i32
  }
  func.func @transform_4(%arg0: i32) -> (i32, i32, i32) {
    %c0_i32 = arith.constant 0 : i32
    %c0_i32_0 = arith.constant 0 : i32
    %c0_i32_1 = arith.constant 0 : i32
    %c0_i32_2 = arith.constant 0 : i32
    return %c0_i32, %c0_i32_0, %c0_i32_1 : i32, i32, i32
  }
  func.func @transform_5(%arg0: i32) -> (i32, i32, i32) {
    %c0_i32 = arith.constant 0 : i32
    %c0_i32_0 = arith.constant 0 : i32
    %c0_i32_1 = arith.constant 0 : i32
    return %arg0, %c0_i32, %c0_i32_0 : i32, i32, i32
  }
}

module attributes {stable_mosaic.version = 11 : i64} {
  func.func @_conv_pool_kernel(%arg0: i32, %arg1: memref<1x14x84xf32, #tpu.memory_space<vmem>>, %arg2: memref<5x84x160xf32, #tpu.memory_space<vmem>>, %arg3: memref<1x160xf32, #tpu.memory_space<vmem>>, %arg4: memref<2x5x10xf32, #tpu.memory_space<vmem>>, %arg5: memref<2x160x80xf32, #tpu.memory_space<vmem>>, %arg6: memref<1x5x80xf32, #tpu.memory_space<vmem>>) attributes {dimension_semantics = [#tpu.dimension_semantics<parallel>], iteration_bounds = array<i64: 2>, scalar_prefetch = 0 : i64, scratch_operands = 0 : i64, tpu.core_type = #tpu.core_type<tc>, window_params = [{transform_indices = @transform_0, window_bounds = array<i64: 1, 14, 84>}, {pipeline_mode = #tpu.pipeline_mode<synchronous>, transform_indices = @transform_1, window_bounds = array<i64: 5, 84, 160>}, {pipeline_mode = #tpu.pipeline_mode<synchronous>, transform_indices = @transform_2, window_bounds = array<i64: 1, 160>}, {pipeline_mode = #tpu.pipeline_mode<synchronous>, transform_indices = @transform_3, window_bounds = array<i64: 2, 5, 10>}, {pipeline_mode = #tpu.pipeline_mode<synchronous>, transform_indices = @transform_4, window_bounds = array<i64: 2, 160, 80>}, {transform_indices = @transform_5, window_bounds = array<i64: 1, 5, 80>}]} {
    %c0 = arith.constant 0 : index
    %c0_0 = arith.constant 0 : index
    %c0_1 = arith.constant 0 : index
    %0 = vector.load %arg1[%c0, %c0_0, %c0_1] : memref<1x14x84xf32, #tpu.memory_space<vmem>>, vector<1x10x84xf32>
    %1 = vector.shape_cast %0 : vector<1x10x84xf32> to vector<10x84xf32>
    %c0_2 = arith.constant 0 : index
    %c0_3 = arith.constant 0 : index
    %c0_4 = arith.constant 0 : index
    %2 = vector.load %arg2[%c0_2, %c0_3, %c0_4] : memref<5x84x160xf32, #tpu.memory_space<vmem>>, vector<1x84x160xf32>
    %3 = vector.shape_cast %2 : vector<1x84x160xf32> to vector<84x160xf32>
    %cst = arith.constant dense<0.000000e+00> : vector<10x160xf32>
    %4 = tpu.matmul %1, %3, %cst {dimension_numbers = #tpu.dot_dimension_numbers<[1], [0], [0], [1], [0, 0, 1, 1], [], []>} : vector<10x84xf32>, vector<84x160xf32>, vector<10x160xf32> -> vector<10x160xf32>
    %c0_5 = arith.constant 0 : index
    %c1 = arith.constant 1 : index
    %c0_6 = arith.constant 0 : index
    %5 = vector.load %arg1[%c0_5, %c1, %c0_6] : memref<1x14x84xf32, #tpu.memory_space<vmem>>, vector<1x10x84xf32>
    %6 = vector.shape_cast %5 : vector<1x10x84xf32> to vector<10x84xf32>
    %c1_7 = arith.constant 1 : index
    %c0_8 = arith.constant 0 : index
    %c0_9 = arith.constant 0 : index
    %7 = vector.load %arg2[%c1_7, %c0_8, %c0_9] : memref<5x84x160xf32, #tpu.memory_space<vmem>>, vector<1x84x160xf32>
    %8 = vector.shape_cast %7 : vector<1x84x160xf32> to vector<84x160xf32>
    %cst_10 = arith.constant dense<0.000000e+00> : vector<10x160xf32>
    %9 = tpu.matmul %6, %8, %cst_10 {dimension_numbers = #tpu.dot_dimension_numbers<[1], [0], [0], [1], [0, 0, 1, 1], [], []>} : vector<10x84xf32>, vector<84x160xf32>, vector<10x160xf32> -> vector<10x160xf32>
    %10 = arith.addf %4, %9 : vector<10x160xf32>
    %c0_11 = arith.constant 0 : index
    %c2 = arith.constant 2 : index
    %c0_12 = arith.constant 0 : index
    %11 = vector.load %arg1[%c0_11, %c2, %c0_12] : memref<1x14x84xf32, #tpu.memory_space<vmem>>, vector<1x10x84xf32>
    %12 = vector.shape_cast %11 : vector<1x10x84xf32> to vector<10x84xf32>
    %c2_13 = arith.constant 2 : index
    %c0_14 = arith.constant 0 : index
    %c0_15 = arith.constant 0 : index
    %13 = vector.load %arg2[%c2_13, %c0_14, %c0_15] : memref<5x84x160xf32, #tpu.memory_space<vmem>>, vector<1x84x160xf32>
    %14 = vector.shape_cast %13 : vector<1x84x160xf32> to vector<84x160xf32>
    %cst_16 = arith.constant dense<0.000000e+00> : vector<10x160xf32>
    %15 = tpu.matmul %12, %14, %cst_16 {dimension_numbers = #tpu.dot_dimension_numbers<[1], [0], [0], [1], [0, 0, 1, 1], [], []>} : vector<10x84xf32>, vector<84x160xf32>, vector<10x160xf32> -> vector<10x160xf32>
    %16 = arith.addf %10, %15 : vector<10x160xf32>
    %c0_17 = arith.constant 0 : index
    %c3 = arith.constant 3 : index
    %c0_18 = arith.constant 0 : index
    %17 = vector.load %arg1[%c0_17, %c3, %c0_18] : memref<1x14x84xf32, #tpu.memory_space<vmem>>, vector<1x10x84xf32>
    %18 = vector.shape_cast %17 : vector<1x10x84xf32> to vector<10x84xf32>
    %c3_19 = arith.constant 3 : index
    %c0_20 = arith.constant 0 : index
    %c0_21 = arith.constant 0 : index
    %19 = vector.load %arg2[%c3_19, %c0_20, %c0_21] : memref<5x84x160xf32, #tpu.memory_space<vmem>>, vector<1x84x160xf32>
    %20 = vector.shape_cast %19 : vector<1x84x160xf32> to vector<84x160xf32>
    %cst_22 = arith.constant dense<0.000000e+00> : vector<10x160xf32>
    %21 = tpu.matmul %18, %20, %cst_22 {dimension_numbers = #tpu.dot_dimension_numbers<[1], [0], [0], [1], [0, 0, 1, 1], [], []>} : vector<10x84xf32>, vector<84x160xf32>, vector<10x160xf32> -> vector<10x160xf32>
    %22 = arith.addf %16, %21 : vector<10x160xf32>
    %c0_23 = arith.constant 0 : index
    %c4 = arith.constant 4 : index
    %c0_24 = arith.constant 0 : index
    %23 = vector.load %arg1[%c0_23, %c4, %c0_24] : memref<1x14x84xf32, #tpu.memory_space<vmem>>, vector<1x10x84xf32>
    %24 = vector.shape_cast %23 : vector<1x10x84xf32> to vector<10x84xf32>
    %c4_25 = arith.constant 4 : index
    %c0_26 = arith.constant 0 : index
    %c0_27 = arith.constant 0 : index
    %25 = vector.load %arg2[%c4_25, %c0_26, %c0_27] : memref<5x84x160xf32, #tpu.memory_space<vmem>>, vector<1x84x160xf32>
    %26 = vector.shape_cast %25 : vector<1x84x160xf32> to vector<84x160xf32>
    %cst_28 = arith.constant dense<0.000000e+00> : vector<10x160xf32>
    %27 = tpu.matmul %24, %26, %cst_28 {dimension_numbers = #tpu.dot_dimension_numbers<[1], [0], [0], [1], [0, 0, 1, 1], [], []>} : vector<10x84xf32>, vector<84x160xf32>, vector<10x160xf32> -> vector<10x160xf32>
    %28 = arith.addf %22, %27 : vector<10x160xf32>
    %c0_29 = arith.constant 0 : index
    %c0_30 = arith.constant 0 : index
    %29 = vector.load %arg3[%c0_29, %c0_30] : memref<1x160xf32, #tpu.memory_space<vmem>>, vector<1x160xf32>
    %30 = vector.broadcast %29 : vector<1x160xf32> to vector<10x160xf32>
    %31 = arith.addf %28, %30 : vector<10x160xf32>
    %cst_31 = arith.constant 0.000000e+00 : f32
    %32 = vector.broadcast %cst_31 : f32 to vector<10x160xf32>
    %33 = arith.cmpf ogt, %31, %32 : vector<10x160xf32>
    %cst_32 = arith.constant 0.00999999977 : f32
    %34 = vector.broadcast %cst_32 : f32 to vector<10x160xf32>
    %35 = arith.mulf %34, %31 : vector<10x160xf32>
    %36 = arith.select %33, %31, %35 : vector<10x160xi1>, vector<10x160xf32>
    %c0_33 = arith.constant 0 : index
    %c0_34 = arith.constant 0 : index
    %c0_35 = arith.constant 0 : index
    %37 = vector.load %arg4[%c0_33, %c0_34, %c0_35] : memref<2x5x10xf32, #tpu.memory_space<vmem>>, vector<1x5x10xf32>
    %38 = vector.shape_cast %37 : vector<1x5x10xf32> to vector<5x10xf32>
    %cst_36 = arith.constant dense<0.000000e+00> : vector<5x160xf32>
    %39 = tpu.matmul %38, %36, %cst_36 {dimension_numbers = #tpu.dot_dimension_numbers<[1], [0], [0], [1], [0, 0, 1, 1], [], []>} : vector<5x10xf32>, vector<10x160xf32>, vector<5x160xf32> -> vector<5x160xf32>
    %c1_37 = arith.constant 1 : index
    %c0_38 = arith.constant 0 : index
    %c0_39 = arith.constant 0 : index
    %40 = vector.load %arg4[%c1_37, %c0_38, %c0_39] : memref<2x5x10xf32, #tpu.memory_space<vmem>>, vector<1x5x10xf32>
    %41 = vector.shape_cast %40 : vector<1x5x10xf32> to vector<5x10xf32>
    %cst_40 = arith.constant dense<0.000000e+00> : vector<5x160xf32>
    %42 = tpu.matmul %41, %36, %cst_40 {dimension_numbers = #tpu.dot_dimension_numbers<[1], [0], [0], [1], [0, 0, 1, 1], [], []>} : vector<5x10xf32>, vector<10x160xf32>, vector<5x160xf32> -> vector<5x160xf32>
    %c0_41 = arith.constant 0 : index
    %c0_42 = arith.constant 0 : index
    %c0_43 = arith.constant 0 : index
    %43 = vector.load %arg5[%c0_41, %c0_42, %c0_43] : memref<2x160x80xf32, #tpu.memory_space<vmem>>, vector<1x160x80xf32>
    %44 = vector.shape_cast %43 : vector<1x160x80xf32> to vector<160x80xf32>
    %cst_44 = arith.constant dense<0.000000e+00> : vector<5x80xf32>
    %45 = tpu.matmul %39, %44, %cst_44 {dimension_numbers = #tpu.dot_dimension_numbers<[1], [0], [0], [1], [0, 0, 1, 1], [], []>} : vector<5x160xf32>, vector<160x80xf32>, vector<5x80xf32> -> vector<5x80xf32>
    %c1_45 = arith.constant 1 : index
    %c0_46 = arith.constant 0 : index
    %c0_47 = arith.constant 0 : index
    %46 = vector.load %arg5[%c1_45, %c0_46, %c0_47] : memref<2x160x80xf32, #tpu.memory_space<vmem>>, vector<1x160x80xf32>
    %47 = vector.shape_cast %46 : vector<1x160x80xf32> to vector<160x80xf32>
    %cst_48 = arith.constant dense<0.000000e+00> : vector<5x80xf32>
    %48 = tpu.matmul %39, %47, %cst_48 {dimension_numbers = #tpu.dot_dimension_numbers<[1], [0], [0], [1], [0, 0, 1, 1], [], []>} : vector<5x160xf32>, vector<160x80xf32>, vector<5x80xf32> -> vector<5x80xf32>
    %49 = arith.maximumf %45, %48 : vector<5x80xf32>
    %c0_49 = arith.constant 0 : index
    %c0_50 = arith.constant 0 : index
    %c0_51 = arith.constant 0 : index
    %50 = vector.load %arg5[%c0_49, %c0_50, %c0_51] : memref<2x160x80xf32, #tpu.memory_space<vmem>>, vector<1x160x80xf32>
    %51 = vector.shape_cast %50 : vector<1x160x80xf32> to vector<160x80xf32>
    %cst_52 = arith.constant dense<0.000000e+00> : vector<5x80xf32>
    %52 = tpu.matmul %42, %51, %cst_52 {dimension_numbers = #tpu.dot_dimension_numbers<[1], [0], [0], [1], [0, 0, 1, 1], [], []>} : vector<5x160xf32>, vector<160x80xf32>, vector<5x80xf32> -> vector<5x80xf32>
    %c1_53 = arith.constant 1 : index
    %c0_54 = arith.constant 0 : index
    %c0_55 = arith.constant 0 : index
    %53 = vector.load %arg5[%c1_53, %c0_54, %c0_55] : memref<2x160x80xf32, #tpu.memory_space<vmem>>, vector<1x160x80xf32>
    %54 = vector.shape_cast %53 : vector<1x160x80xf32> to vector<160x80xf32>
    %cst_56 = arith.constant dense<0.000000e+00> : vector<5x80xf32>
    %55 = tpu.matmul %42, %54, %cst_56 {dimension_numbers = #tpu.dot_dimension_numbers<[1], [0], [0], [1], [0, 0, 1, 1], [], []>} : vector<5x160xf32>, vector<160x80xf32>, vector<5x80xf32> -> vector<5x80xf32>
    %56 = arith.maximumf %52, %55 : vector<5x80xf32>
    %57 = arith.maximumf %49, %56 : vector<5x80xf32>
    %c0_57 = arith.constant 0 : index
    %c0_58 = arith.constant 0 : index
    %c0_59 = arith.constant 0 : index
    %58 = vector.load %arg6[%c0_57, %c0_58, %c0_59] : memref<1x5x80xf32, #tpu.memory_space<vmem>>, vector<1x5x80xf32>
    %59 = vector.shape_cast %58 : vector<1x5x80xf32> to vector<5x80xf32>
    %60 = vector.shape_cast %57 : vector<5x80xf32> to vector<1x5x80xf32>
    tpu.vector_store %arg6[%c0_57, %c0_58, %c0_59], %60 {strides = array<i32>} : memref<1x5x80xf32, #tpu.memory_space<vmem>>, vector<1x5x80xf32>,
    return
  }
  func.func @transform_0(%arg0: i32) -> (i32, i32, i32) {
    %c0_i32 = arith.constant 0 : i32
    %c0_i32_0 = arith.constant 0 : i32
    %c0_i32_1 = arith.constant 0 : i32
    return %arg0, %c0_i32, %c0_i32_0 : i32, i32, i32
  }
  func.func @transform_1(%arg0: i32) -> (i32, i32, i32) {
    %c0_i32 = arith.constant 0 : i32
    %c0_i32_0 = arith.constant 0 : i32
    %c0_i32_1 = arith.constant 0 : i32
    %c0_i32_2 = arith.constant 0 : i32
    return %c0_i32, %c0_i32_0, %c0_i32_1 : i32, i32, i32
  }
  func.func @transform_2(%arg0: i32) -> (i32, i32) {
    %c0_i32 = arith.constant 0 : i32
    %c0_i32_0 = arith.constant 0 : i32
    %c0_i32_1 = arith.constant 0 : i32
    return %c0_i32, %c0_i32_0 : i32, i32
  }
  func.func @transform_3(%arg0: i32) -> (i32, i32, i32) {
    %c0_i32 = arith.constant 0 : i32
    %c0_i32_0 = arith.constant 0 : i32
    %c0_i32_1 = arith.constant 0 : i32
    %c0_i32_2 = arith.constant 0 : i32
    return %c0_i32, %c0_i32_0, %c0_i32_1 : i32, i32, i32
  }
  func.func @transform_4(%arg0: i32) -> (i32, i32, i32) {
    %c0_i32 = arith.constant 0 : i32
    %c0_i32_0 = arith.constant 0 : i32
    %c0_i32_1 = arith.constant 0 : i32
    %c0_i32_2 = arith.constant 0 : i32
    return %c0_i32, %c0_i32_0, %c0_i32_1 : i32, i32, i32
  }
  func.func @transform_5(%arg0: i32) -> (i32, i32, i32) {
    %c0_i32 = arith.constant 0 : i32
    %c0_i32_0 = arith.constant 0 : i32
    %c0_i32_1 = arith.constant 0 : i32
    return %arg0, %c0_i32, %c0_i32_0 : i32, i32, i32
  }
}

module attributes {stable_mosaic.version = 11 : i64} {
  func.func @_fc_kernel(%arg0: i32, %arg1: memref<2x400xf32, #tpu.memory_space<vmem>>, %arg2: memref<400x120xf32, #tpu.memory_space<vmem>>, %arg3: memref<1x120xf32, #tpu.memory_space<vmem>>, %arg4: memref<120x84xf32, #tpu.memory_space<vmem>>, %arg5: memref<1x84xf32, #tpu.memory_space<vmem>>, %arg6: memref<84x10xf32, #tpu.memory_space<vmem>>, %arg7: memref<1x10xf32, #tpu.memory_space<vmem>>, %arg8: memref<2x10xf32, #tpu.memory_space<vmem>>) attributes {dimension_semantics = [#tpu.dimension_semantics<parallel>], iteration_bounds = array<i64: 1>, scalar_prefetch = 0 : i64, scratch_operands = 0 : i64, tpu.core_type = #tpu.core_type<tc>, window_params = [{transform_indices = @transform_0, window_bounds = array<i64: 2, 400>}, {pipeline_mode = #tpu.pipeline_mode<synchronous>, transform_indices = @transform_1, window_bounds = array<i64: 400, 120>}, {pipeline_mode = #tpu.pipeline_mode<synchronous>, transform_indices = @transform_2, window_bounds = array<i64: 1, 120>}, {pipeline_mode = #tpu.pipeline_mode<synchronous>, transform_indices = @transform_3, window_bounds = array<i64: 120, 84>}, {pipeline_mode = #tpu.pipeline_mode<synchronous>, transform_indices = @transform_4, window_bounds = array<i64: 1, 84>}, {pipeline_mode = #tpu.pipeline_mode<synchronous>, transform_indices = @transform_5, window_bounds = array<i64: 84, 10>}, {pipeline_mode = #tpu.pipeline_mode<synchronous>, transform_indices = @transform_6, window_bounds = array<i64: 1, 10>}, {transform_indices = @transform_7, window_bounds = array<i64: 2, 10>}]} {
    %c0 = arith.constant 0 : index
    %c0_0 = arith.constant 0 : index
    %0 = vector.load %arg1[%c0, %c0_0] : memref<2x400xf32, #tpu.memory_space<vmem>>, vector<2x400xf32>
    %c0_1 = arith.constant 0 : index
    %c0_2 = arith.constant 0 : index
    %1 = vector.load %arg2[%c0_1, %c0_2] : memref<400x120xf32, #tpu.memory_space<vmem>>, vector<400x120xf32>
    %cst = arith.constant dense<0.000000e+00> : vector<2x120xf32>
    %2 = tpu.matmul %0, %1, %cst {dimension_numbers = #tpu.dot_dimension_numbers<[1], [0], [0], [1], [0, 0, 1, 1], [], []>} : vector<2x400xf32>, vector<400x120xf32>, vector<2x120xf32> -> vector<2x120xf32>
    %c0_3 = arith.constant 0 : index
    %c0_4 = arith.constant 0 : index
    %3 = vector.load %arg3[%c0_3, %c0_4] : memref<1x120xf32, #tpu.memory_space<vmem>>, vector<1x120xf32>
    %4 = vector.broadcast %3 : vector<1x120xf32> to vector<2x120xf32>
    %5 = arith.addf %2, %4 : vector<2x120xf32>
    %cst_5 = arith.constant 0.000000e+00 : f32
    %6 = vector.broadcast %cst_5 : f32 to vector<2x120xf32>
    %7 = arith.cmpf ogt, %5, %6 : vector<2x120xf32>
    %cst_6 = arith.constant 0.00999999977 : f32
    %8 = vector.broadcast %cst_6 : f32 to vector<2x120xf32>
    %9 = arith.mulf %8, %5 : vector<2x120xf32>
    %10 = arith.select %7, %5, %9 : vector<2x120xi1>, vector<2x120xf32>
    %c0_7 = arith.constant 0 : index
    %c0_8 = arith.constant 0 : index
    %11 = vector.load %arg4[%c0_7, %c0_8] : memref<120x84xf32, #tpu.memory_space<vmem>>, vector<120x84xf32>
    %cst_9 = arith.constant dense<0.000000e+00> : vector<2x84xf32>
    %12 = tpu.matmul %10, %11, %cst_9 {dimension_numbers = #tpu.dot_dimension_numbers<[1], [0], [0], [1], [0, 0, 1, 1], [], []>} : vector<2x120xf32>, vector<120x84xf32>, vector<2x84xf32> -> vector<2x84xf32>
    %c0_10 = arith.constant 0 : index
    %c0_11 = arith.constant 0 : index
    %13 = vector.load %arg5[%c0_10, %c0_11] : memref<1x84xf32, #tpu.memory_space<vmem>>, vector<1x84xf32>
    %14 = vector.broadcast %13 : vector<1x84xf32> to vector<2x84xf32>
    %15 = arith.addf %12, %14 : vector<2x84xf32>
    %cst_12 = arith.constant 0.000000e+00 : f32
    %16 = vector.broadcast %cst_12 : f32 to vector<2x84xf32>
    %17 = arith.cmpf ogt, %15, %16 : vector<2x84xf32>
    %cst_13 = arith.constant 0.00999999977 : f32
    %18 = vector.broadcast %cst_13 : f32 to vector<2x84xf32>
    %19 = arith.mulf %18, %15 : vector<2x84xf32>
    %20 = arith.select %17, %15, %19 : vector<2x84xi1>, vector<2x84xf32>
    %c0_14 = arith.constant 0 : index
    %c0_15 = arith.constant 0 : index
    %21 = vector.load %arg6[%c0_14, %c0_15] : memref<84x10xf32, #tpu.memory_space<vmem>>, vector<84x10xf32>
    %cst_16 = arith.constant dense<0.000000e+00> : vector<2x10xf32>
    %22 = tpu.matmul %20, %21, %cst_16 {dimension_numbers = #tpu.dot_dimension_numbers<[1], [0], [0], [1], [0, 0, 1, 1], [], []>} : vector<2x84xf32>, vector<84x10xf32>, vector<2x10xf32> -> vector<2x10xf32>
    %c0_17 = arith.constant 0 : index
    %c0_18 = arith.constant 0 : index
    %23 = vector.load %arg7[%c0_17, %c0_18] : memref<1x10xf32, #tpu.memory_space<vmem>>, vector<1x10xf32>
    %24 = vector.broadcast %23 : vector<1x10xf32> to vector<2x10xf32>
    %25 = arith.addf %22, %24 : vector<2x10xf32>
    %c0_19 = arith.constant 0 : index
    %c0_20 = arith.constant 0 : index
    %26 = vector.load %arg8[%c0_19, %c0_20] : memref<2x10xf32, #tpu.memory_space<vmem>>, vector<2x10xf32>
    tpu.vector_store %arg8[%c0_19, %c0_20], %25 {strides = array<i32>} : memref<2x10xf32, #tpu.memory_space<vmem>>, vector<2x10xf32>,
    return
  }
  func.func @transform_0(%arg0: i32) -> (i32, i32) {
    %c0_i32 = arith.constant 0 : i32
    %c0_i32_0 = arith.constant 0 : i32
    return %arg0, %c0_i32 : i32, i32
  }
  func.func @transform_1(%arg0: i32) -> (i32, i32) {
    %c0_i32 = arith.constant 0 : i32
    %c0_i32_0 = arith.constant 0 : i32
    %c0_i32_1 = arith.constant 0 : i32
    return %c0_i32, %c0_i32_0 : i32, i32
  }
  func.func @transform_2(%arg0: i32) -> (i32, i32) {
    %c0_i32 = arith.constant 0 : i32
    %c0_i32_0 = arith.constant 0 : i32
    %c0_i32_1 = arith.constant 0 : i32
    return %c0_i32, %c0_i32_0 : i32, i32
  }
  func.func @transform_3(%arg0: i32) -> (i32, i32) {
    %c0_i32 = arith.constant 0 : i32
    %c0_i32_0 = arith.constant 0 : i32
    %c0_i32_1 = arith.constant 0 : i32
    return %c0_i32, %c0_i32_0 : i32, i32
  }
  func.func @transform_4(%arg0: i32) -> (i32, i32) {
    %c0_i32 = arith.constant 0 : i32
    %c0_i32_0 = arith.constant 0 : i32
    %c0_i32_1 = arith.constant 0 : i32
    return %c0_i32, %c0_i32_0 : i32, i32
  }
  func.func @transform_5(%arg0: i32) -> (i32, i32) {
    %c0_i32 = arith.constant 0 : i32
    %c0_i32_0 = arith.constant 0 : i32
    %c0_i32_1 = arith.constant 0 : i32
    return %c0_i32, %c0_i32_0 : i32, i32
  }
  func.func @transform_6(%arg0: i32) -> (i32, i32) {
    %c0_i32 = arith.constant 0 : i32
    %c0_i32_0 = arith.constant 0 : i32
    %c0_i32_1 = arith.constant 0 : i32
    return %c0_i32, %c0_i32_0 : i32, i32
  }
  func.func @transform_7(%arg0: i32) -> (i32, i32) {
    %c0_i32 = arith.constant 0 : i32
    %c0_i32_0 = arith.constant 0 : i32
    return %arg0, %c0_i32 : i32, i32
  }
}

</mosaic_0001>

<bundles_post_ra>
// kernel: net_forward.3
= control target key start
LH: loop header
LB: loop body
LE: loop exit
PB: predicated region body
PF: predicated region fallthrough
CT: control target
= control target key end

     0   :  { %s1759_s18 = smov 0   ;;  %s2625_s0 = inlined_call_operand.vmem [shape: f32[2,32,96], index: 0, kind: input, shape index: {}]   ;;  %s2626_s1 = inlined_call_operand.vmem [shape: f32[5,96,168], index: 1, kind: input, shape index: {}]   ;;  %s2627_s2 = inlined_call_operand.vmem [shape: f32[1,168], index: 2, kind: input, shape index: {}]   ;;  %s2628_s3 = inlined_call_operand.vmem [shape: f32[2,14,28], index: 3, kind: input, shape index: {}]   ;;  %s2629_s4 = inlined_call_operand.vmem [shape: f32[2,168,84], index: 4, kind: input, shape index: {}]   ;;  %s2630_s5 = inlined_call_operand.vmem [shape: f32[2,14,84], index: 5, kind: output, shape index: {}]  }
   0x1 LB: > { %s1543_s19 = sadd.s32 4294967295, %s1726_s18   ;;  %p1547_p0 = scmp.ge.s32.totalorder %s1726_s18, 1  ;;  %s1726_s18 = sphi %s1759_s18, %s15_s18  }
   0x2   : > { %p187_p1 = scmp.lt.s32.totalorder %s1726_s18, 3 }
   0x4   : > { %p188_p2 = pnand %p1547_p0, %p187_p1 }
   0x6   : > { %191 = sbr.rel (%p188_p2) target bundleno = 758 (0x2f6), region = 40 }
   0xb   : > { %v1575_v0 = vld [vmem:[%s2626_s1 + $0x178] sm:$0xff]  ;;  %v1574_v2 = vld [vmem:[%s2626_s1 + $0x170] sm:$0xff]  ;;  %v1573_v4 = vld [vmem:[%s2626_s1 + $0x168] sm:$0xff]  ;;  %p1841_p3 = scmp.lt.s32.totalorder %s1543_s19, 1  ;;  %vm282_vm0 = vcmask 785408   ;;  %v2631_v50 = vmov 0.0  }
   0xc   : > { %v252_v1 = vld [vmem:[%s2626_s1 + $0xb8] sm:$0xff]  ;;  %303 = vmatprep.subr.mxu0 %v1575_v0  ;;  %v251_v3 = vld [vmem:[%s2626_s1 + $0xb0] sm:$0xff]  ;;  %v250_v5 = vld [vmem:[%s2626_s1 + $0xa8] sm:$0xff]  ;;  %359 = vmatprep.mubr.f32.mxu0 %v2631_v50  ;;  %vm952_vm1 = vcmask 1043456   ;;  %vm945_vm10 = vcmask 228352   ;;  %vm1143_vm11 = vcmask 326656  }
   0xd   : > { %404 = vmatprep.subr.mxu1 %v252_v1  ;;  %304 = vmatpush1.msra.mxu0 %v1574_v2  ;;  %v1572_v6 = vld [vmem:[%s2626_s1 + $0x160] sm:$0xff]  ;;  %v1571_v8 = vld [vmem:[%s2626_s1 + $0x158] sm:$0xff]  ;;  %v1570_v10 = vld [vmem:[%s2626_s1 + $0x150] sm:$0xff]  ;;  %s2660_s19 = smov (!%p1841_p3, %s1543_s19), 1  ;;  %vm1484_vm12 = vcmask 687104   ;;  %vm1486_vm13 = vcmask 685056  }
   0xe   : > { %405 = vmatpush1.msra.mxu1 %v251_v3  ;;  %v249_v7 = vld [vmem:[%s2626_s1 + $0xa0] sm:$0xff]  ;;  %305 = vmatprep.subr.mxu0 %v1573_v4  ;;  %v248_v9 = vld [vmem:[%s2626_s1 + $0x98] sm:$0xff]  ;;  %v247_v11 = vld [vmem:[%s2626_s1 + $0x90] sm:$0xff]  ;;  %s1709_s7 = sshll.u32 %s2660_s19, 5  ;;  %s1710_s20 = sshll.u32 %s2660_s19, 4 }
   0xf   : > { %406 = vmatprep.subr.mxu1 %v250_v5  ;;  %306 = vmatpush1.msra.mxu0 %v1572_v6  ;;  %v1569_v12 = vld [vmem:[%s2626_s1 + $0x148] sm:$0xff]  ;;  %v1568_v14 = vld [vmem:[%s2626_s1 + $0x140] sm:$0xff]  ;;  %v1567_v16 = vld [vmem:[%s2626_s1 + $0x138] sm:$0xff]  ;;  %s1921_s24 = scalar_lea.vmem %s2625_s0, %s1709_s7  ;;  %s224_s23 = scalar_lea.vmem %s2630_s5, %s1710_s20 }
  0x10   : > { %407 = vmatpush1.msra.mxu1 %v249_v7  ;;  %v246_v13 = vld [vmem:[%s2626_s1 + $0x88] sm:$0xff]  ;;  %307 = vmatprep.subr.mxu0 %v1571_v8  ;;  %v245_v15 = vld [vmem:[%s2626_s1 + $0x80] sm:$0xff]  ;;  %v244_v17 = vld [vmem:[%s2626_s1 + $0x78] sm:$0xff] }
  0x11   : > { %408 = vmatprep.subr.mxu1 %v248_v9  ;;  %308 = vmatpush1.msra.mxu0 %v1570_v10  ;;  %v1566_v18 = vld [vmem:[%s2626_s1 + $0x130] sm:$0xff]  ;;  %v1565_v20 = vld [vmem:[%s2626_s1 + $0x128] sm:$0xff]  ;;  %v1564_v22 = vld [vmem:[%s2626_s1 + $0x120] sm:$0xff] }
  0x12   : > { %409 = vmatpush1.msra.mxu1 %v247_v11  ;;  %309 = vmatprep.subr.mxu0 %v1569_v12  ;;  %v243_v19 = vld [vmem:[%s2626_s1 + $0x70] sm:$0xff]  ;;  %v242_v21 = vld [vmem:[%s2626_s1 + $0x68] sm:$0xff]  ;;  %v241_v23 = vld [vmem:[%s2626_s1 + $0x60] sm:$0xff] }
  0x13   : > { %410 = vmatprep.subr.mxu1 %v246_v13  ;;  %310 = vmatpush1.msra.mxu0 %v1568_v14  ;;  %v1563_v24 = vld [vmem:[%s2626_s1 + $0x118] sm:$0xff]  ;;  %v1562_v26 = vld [vmem:[%s2626_s1 + $0x110] sm:$0xff]  ;;  %v1561_v28 = vld [vmem:[%s2626_s1 + $0x108] sm:$0xff] }
  0x14   : > { %411 = vmatpush1.msra.mxu1 %v245_v15  ;;  %311 = vmatprep.subr.mxu0 %v1567_v16  ;;  %v240_v25 = vld [vmem:[%s2626_s1 + $0x58] sm:$0xff]  ;;  %v239_v27 = vld [vmem:[%s2626_s1 + $0x50] sm:$0xff]  ;;  %v238_v29 = vld [vmem:[%s2626_s1 + $0x48] sm:$0xff] }
  0x15   : > { %412 = vmatprep.subr.mxu1 %v244_v17  ;;  %312 = vmatpush1.msra.mxu0 %v1566_v18  ;;  %v1560_v30 = vld [vmem:[%s2626_s1 + $0x100] sm:$0xff]  ;;  %v1559_v32 = vld [vmem:[%s2626_s1 + $0xf8] sm:$0xff]  ;;  %v1558_v34 = vld [vmem:[%s2626_s1 + $0xf0] sm:$0xff] }
  0x16   : > { %413 = vmatpush1.msra.mxu1 %v243_v19  ;;  %313 = vmatprep.subr.mxu0 %v1565_v20  ;;  %v237_v31 = vld [vmem:[%s2626_s1 + $0x40] sm:$0xff]  ;;  %v236_v33 = vld [vmem:[%s2626_s1 + $0x38] sm:$0xff]  ;;  %v235_v35 = vld [vmem:[%s2626_s1 + $0x30] sm:$0xff] }
  0x17   : > { %414 = vmatprep.subr.mxu1 %v242_v21  ;;  %314 = vmatpush1.msra.mxu0 %v1564_v22  ;;  %v1557_v36 = vld [vmem:[%s2626_s1 + $0xe8] sm:$0xff]  ;;  %v1556_v38 = vld [vmem:[%s2626_s1 + $0xe0] sm:$0xff]  ;;  %v1555_v40 = vld [vmem:[%s2626_s1 + $0xd8] sm:$0xff] }
  0x18   : > { %415 = vmatpush1.msra.mxu1 %v241_v23  ;;  %315 = vmatprep.subr.mxu0 %v1563_v24  ;;  %v234_v37 = vld [vmem:[%s2626_s1 + $0x28] sm:$0xff]  ;;  %v233_v39 = vld [vmem:[%s2626_s1 + $0x20] sm:$0xff]  ;;  %v232_v41 = vld [vmem:[%s2626_s1 + $0x18] sm:$0xff] }
  0x19   : > { %416 = vmatprep.subr.mxu1 %v240_v25  ;;  %316 = vmatpush1.msra.mxu0 %v1562_v26  ;;  %v1554_v42 = vld [vmem:[%s2626_s1 + $0xd0] sm:$0xff]  ;;  %v1553_v44 = vld [vmem:[%s2626_s1 + $0xc8] sm:$0xff]  ;;  %v1552_v46 = vld [vmem:[%s2626_s1 + $0xc0] sm:$0xff] }
  0x1a   : > { %417 = vmatpush1.msra.mxu1 %v239_v27  ;;  %317 = vmatprep.subr.mxu0 %v1561_v28  ;;  %v231_v43 = vld [vmem:[%s2626_s1 + $0x10] sm:$0xff]  ;;  %v230_v45 = vld [vmem:[%s2626_s1 + $0x8] sm:$0xff]  ;;  %v229_v47 = vld [vmem:[%s2626_s1] sm:$0xff] }
  0x1b   : > { %418 = vmatprep.subr.mxu1 %v238_v29  ;;  %318 = vmatpush1.msra.mxu0 %v1560_v30  ;;  %v253_v48 = vld [vmem:[%s1921_s24 + $0x1] sm:$0xff]  ;;  %v1607_v51 = vld [vmem:[%s2626_s1 + $0x238] sm:$0xff]  ;;  %v1606_v53 = vld [vmem:[%s2626_s1 + $0x230] sm:$0xff] }
  0x1c   : > { %419 = vmatpush1.msra.mxu1 %v237_v31  ;;  %319 = vmatprep.subr.mxu0 %v1559_v32  ;;  %v225_v49 = vld [vmem:[%s1921_s24] sm:$0xff]  ;;  %v1635_v52 = vld [vmem:[%s2626_s1 + $0x2f8] sm:$0xff]  ;;  %v1634_v54 = vld [vmem:[%s2626_s1 + $0x2f0] sm:$0xff] }
  0x1d   : > { %420 = vmatprep.subr.mxu1 %v236_v33  ;;  %320 = vmatpush1.msra.mxu0 %v1558_v34  ;;  %v1605_v55 = vld [vmem:[%s2626_s1 + $0x228] sm:$0xff]  ;;  %v1604_v57 = vld [vmem:[%s2626_s1 + $0x220] sm:$0xff]  ;;  %v1603_v59 = vld [vmem:[%s2626_s1 + $0x218] sm:$0xff] }
  0x1e   : > { %421 = vmatpush1.msra.mxu1 %v235_v35  ;;  %321 = vmatprep.subr.mxu0 %v1557_v36  ;;  %v1633_v56 = vld [vmem:[%s2626_s1 + $0x2e8] sm:$0xff]  ;;  %v1632_v58 = vld [vmem:[%s2626_s1 + $0x2e0] sm:$0xff]  ;;  %v1631_v60 = vld [vmem:[%s2626_s1 + $0x2d8] sm:$0xff] }
  0x1f   : > { %422 = vmatprep.subr.mxu1 %v234_v37  ;;  %322 = vmatpush1.msra.mxu0 %v1556_v38  ;;  %v1602_v61 = vld [vmem:[%s2626_s1 + $0x210] sm:$0xff]  ;;  %v1601_v63 = vld [vmem:[%s2626_s1 + $0x208] sm:$0xff]  ;;  %v1600_v1 = vld [vmem:[%s2626_s1 + $0x200] sm:$0xff] }
  0x20   : > { %423 = vmatpush1.msra.mxu1 %v233_v39  ;;  %323 = vmatprep.subr.mxu0 %v1555_v40  ;;  %v1630_v62 = vld [vmem:[%s2626_s1 + $0x2d0] sm:$0xff]  ;;  %v1629_v0 = vld [vmem:[%s2626_s1 + $0x2c8] sm:$0xff]  ;;  %v1628_v2 = vld [vmem:[%s2626_s1 + $0x2c0] sm:$0xff] }
  0x21   : > { %424 = vmatprep.subr.mxu1 %v232_v41  ;;  %324 = vmatpush1.msra.mxu0 %v1554_v42  ;;  %v1599_v3 = vld [vmem:[%s2626_s1 + $0x1f8] sm:$0xff]  ;;  %v1598_v4 = vld [vmem:[%s2626_s1 + $0x1f0] sm:$0xff]  ;;  %v1597_v5 = vld [vmem:[%s2626_s1 + $0x1e8] sm:$0xff] }
  0x22   : > { %425 = vmatpush1.msra.mxu1 %v231_v43  ;;  %325 = vmatprep.subr.mxu0 %v1553_v44  ;;  %v1627_v6 = vld [vmem:[%s2626_s1 + $0x2b8] sm:$0xff]  ;;  %v254_v7 = vld [vmem:[%s1921_s24 + $0x9] sm:$0xff]  ;;  %v1596_v9 = vld [vmem:[%s2626_s1 + $0x1e0] sm:$0xff] }
  0x23   : > { %426 = vmatprep.subr.mxu1 %v230_v45  ;;  %326 = vmatpush1.msra.mxu0 %v1552_v46  ;;  %v226_v8 = vld [vmem:[%s1921_s24 + $0x8] sm:$0xff]  ;;  %v1626_v10 = vld [vmem:[%s2626_s1 + $0x2b0] sm:$0xff]  ;;  %v1595_v11 = vld [vmem:[%s2626_s1 + $0x1d8] sm:$0xff] }
  0x24   : > { %427 = vmatpush1.msra.mxu1 %v229_v47  ;;  %460 = vmatprep.mubr.f32.mxu1 %v2631_v50  ;;  %v1625_v12 = vld [vmem:[%s2626_s1 + $0x2a8] sm:$0xff]  ;;  %v1594_v13 = vld [vmem:[%s2626_s1 + $0x1d0] sm:$0xff]  ;;  %v1624_v14 = vld [vmem:[%s2626_s1 + $0x2a0] sm:$0xff] }
  0x25   : > { %1576 = vmatmul.mubr.msk.f32.vlgmr.msra.gmra.mxu0 %vm282_vm0, %v253_v48  ;;  %1580 = vmatmul.mubr.msk.f32.vlgmr.msra.gmra.mxu1 %vm282_vm0, %v225_v49  ;;  %v1593_v15 = vld [vmem:[%s2626_s1 + $0x1c8] sm:$0xff]  ;;  %v1623_v16 = vld [vmem:[%s2626_s1 + $0x298] sm:$0xff]  ;;  %v227_v18 = vld [vmem:[%s1921_s24 + $0x10] sm:$0xff] }
  0x26   : > { %534 = vmatprep.subr.mxu0 %v1607_v51  ;;  %672 = vmatprep.subr.mxu1 %v1635_v52  ;;  %v255_v17 = vld [vmem:[%s1921_s24 + $0x11] sm:$0xff]  ;;  %v1592_v19 = vld [vmem:[%s2626_s1 + $0x1c0] sm:$0xff]  ;;  %v1621_v22 = vld [vmem:[%s2626_s1 + $0x288] sm:$0xff] }
  0x27   : > { %535 = vmatpush1.msra.mxu0 %v1606_v53  ;;  %673 = vmatpush1.msra.mxu1 %v1634_v54  ;;  %v1622_v20 = vld [vmem:[%s2626_s1 + $0x290] sm:$0xff]  ;;  %v1591_v21 = vld [vmem:[%s2626_s1 + $0x1b8] sm:$0xff]  ;;  %v1620_v24 = vld [vmem:[%s2626_s1 + $0x280] sm:$0xff] }
  0x28   : > { %536 = vmatprep.subr.mxu0 %v1605_v55  ;;  %674 = vmatprep.subr.mxu1 %v1633_v56  ;;  %v1590_v23 = vld [vmem:[%s2626_s1 + $0x1b0] sm:$0xff]  ;;  %v1589_v25 = vld [vmem:[%s2626_s1 + $0x1a8] sm:$0xff]  ;;  %v1619_v26 = vld [vmem:[%s2626_s1 + $0x278] sm:$0xff] }
  0x29   : > { %537 = vmatpush1.msra.mxu0 %v1604_v57  ;;  %675 = vmatpush1.msra.mxu1 %v1632_v58  ;;  %v256_v27 = vld [vmem:[%s1921_s24 + $0x19] sm:$0xf]  ;;  %v1588_v29 = vld [vmem:[%s2626_s1 + $0x1a0] sm:$0xff]  ;;  %v1618_v30 = vld [vmem:[%s2626_s1 + $0x270] sm:$0xff] }
  0x2a   : > { %538 = vmatprep.subr.mxu0 %v1603_v59  ;;  %676 = vmatprep.subr.mxu1 %v1631_v60  ;;  %v228_v28 = vld [vmem:[%s1921_s24 + $0x18] sm:$0xf]  ;;  %v1617_v32 = vld [vmem:[%s2626_s1 + $0x268] sm:$0xff]  ;;  %v1586_v33 = vld [vmem:[%s2626_s1 + $0x190] sm:$0xff] }
  0x2b   : > { %539 = vmatpush1.msra.mxu0 %v1602_v61  ;;  %677 = vmatpush1.msra.mxu1 %v1630_v62  ;;  %v1587_v31 = vld [vmem:[%s2626_s1 + $0x198] sm:$0xff]  ;;  %v1616_v34 = vld [vmem:[%s2626_s1 + $0x260] sm:$0xff]  ;;  %v1585_v35 = vld [vmem:[%s2626_s1 + $0x188] sm:$0xff] }
  0x2c   : > { %540 = vmatprep.subr.mxu0 %v1601_v63  ;;  %678 = vmatprep.subr.mxu1 %v1629_v0  ;;  %v1615_v36 = vld [vmem:[%s2626_s1 + $0x258] sm:$0xff]  ;;  %v1584_v37 = vld [vmem:[%s2626_s1 + $0x180] sm:$0xff]  ;;  %v1614_v38 = vld [vmem:[%s2626_s1 + $0x250] sm:$0xff] }
  0x2d   : > { %541 = vmatpush1.msra.mxu0 %v1600_v1  ;;  %679 = vmatpush1.msra.mxu1 %v1628_v2  ;;  %v485_v39 = vld [vmem:[%s1921_s24 + $0x2] sm:$0xff]  ;;  %v1663_v41 = vld [vmem:[%s2626_s1 + $0x3b8] sm:$0xff]  ;;  %v1662_v43 = vld [vmem:[%s2626_s1 + $0x3b0] sm:$0xff] }
  0x2e   : > { %542 = vmatprep.subr.mxu0 %v1599_v3  ;;  %365 = vmatprep.mubr.f32.mxu0 %v2631_v50  ;;  %v1613_v40 = vld [vmem:[%s2626_s1 + $0x248] sm:$0xff]  ;;  %v1612_v42 = vld [vmem:[%s2626_s1 + $0x240] sm:$0xff]  ;;  %v1659_v48 = vld [vmem:[%s2626_s1 + $0x398] sm:$0xff] }
  0x2f   : > { %543 = vmatpush1.msra.mxu0 %v1598_v4  ;;  %466 = vmatprep.mubr.f32.mxu1 %v2631_v50  ;;  %v623_v44 = vld [vmem:[%s1921_s24 + $0x3] sm:$0xff]  ;;  %v1658_v49 = vld [vmem:[%s2626_s1 + $0x390] sm:$0xff]  ;;  %v1655_v55 = vld [vmem:[%s2626_s1 + $0x378] sm:$0xff] }
  0x30   : > { %544 = vmatprep.subr.mxu0 %v1597_v5  ;;  %680 = vmatprep.subr.mxu1 %v1627_v6  ;;  %v1661_v45 = vld [vmem:[%s2626_s1 + $0x3a8] sm:$0xff]  ;;  %v1660_v46 = vld [vmem:[%s2626_s1 + $0x3a0] sm:$0xff]  ;;  %v487_v54 = vld [vmem:[%s1921_s24 + $0x12] sm:$0xff] }
  0x31   : > { %1577 = vmatmul.mubr.msk.f32.gmra.mxu0 %vm282_vm0, %v254_v7  ;;  %1581 = vmatmul.mubr.msk.f32.gmra.mxu1 %vm282_vm0, %v226_v8  ;;  %v486_v47 = vld [vmem:[%s1921_s24 + $0xa] sm:$0xff]  ;;  %v1656_v53 = vld [vmem:[%s2626_s1 + $0x380] sm:$0xff]  ;;  %v625_v57 = vld [vmem:[%s1921_s24 + $0x13] sm:$0xff] }
  0x32   : > { %545 = vmatpush1.msra.mxu0 %v1596_v9  ;;  %681 = vmatpush1.msra.mxu1 %v1626_v10  ;;  %v624_v51 = vld [vmem:[%s1921_s24 + $0xb] sm:$0xff]  ;;  %v1652_v59 = vld [vmem:[%s2626_s1 + $0x360] sm:$0xff]  ;;  %v488_v60 = vld [vmem:[%s1921_s24 + $0x1a] sm:$0xf] }
  0x33   : > { %546 = vmatprep.subr.mxu0 %v1595_v11  ;;  %682 = vmatprep.subr.mxu1 %v1625_v12  ;;  %v1657_v52 = vld [vmem:[%s2626_s1 + $0x388] sm:$0xff]  ;;  %v1654_v56 = vld [vmem:[%s2626_s1 + $0x370] sm:$0xff]  ;;  %v1651_v61 = vld [vmem:[%s2626_s1 + $0x358] sm:$0xff] }
  0x34   : > { %547 = vmatpush1.msra.mxu0 %v1594_v13  ;;  %683 = vmatpush1.msra.mxu1 %v1624_v14  ;;  %v1653_v58 = vld [vmem:[%s2626_s1 + $0x368] sm:$0xff]  ;;  %v1650_v62 = vld [vmem:[%s2626_s1 + $0x350] sm:$0xff]  ;;  %v626_v63 = vld [vmem:[%s1921_s24 + $0x1b] sm:$0xf] }
  0x35   : > { %371 = vmatprep.mubr.f32.mxu0 %v2631_v50  ;;  %472 = vmatprep.mubr.f32.mxu1 %v2631_v50  ;;  %v1649_v0 = vld [vmem:[%s2626_s1 + $0x348] sm:$0xff]  ;;  %v1648_v1 = vld [vmem:[%s2626_s1 + $0x340] sm:$0xff]  ;;  %v1647_v2 = vld [vmem:[%s2626_s1 + $0x338] sm:$0xff] }
  0x36   : > { %548 = vmatprep.subr.mxu0 %v1593_v15  ;;  %684 = vmatprep.subr.mxu1 %v1623_v16  ;;  %v1646_v3 = vld [vmem:[%s2626_s1 + $0x330] sm:$0xff]  ;;  %v1645_v4 = vld [vmem:[%s2626_s1 + $0x328] sm:$0xff]  ;;  %v1644_v5 = vld [vmem:[%s2626_s1 + $0x320] sm:$0xff] }
  0x37   : > { %1578 = vmatmul.mubr.msk.f32.gmra.mxu0 %vm282_vm0, %v255_v17  ;;  %1582 = vmatmul.mubr.msk.f32.gmra.mxu1 %vm282_vm0, %v227_v18  ;;  %v1643_v6 = vld [vmem:[%s2626_s1 + $0x318] sm:$0xff]  ;;  %v1642_v7 = vld [vmem:[%s2626_s1 + $0x310] sm:$0xff]  ;;  %v1641_v8 = vld [vmem:[%s2626_s1 + $0x308] sm:$0xff] }
  0x38   : > { %549 = vmatpush1.msra.mxu0 %v1592_v19  ;;  %685 = vmatpush1.msra.mxu1 %v1622_v20  ;;  %v1640_v9 = vld [vmem:[%s2626_s1 + $0x300] sm:$0xff]  ;;  %v762_v11 = vld [vmem:[%s1921_s24 + $0xc] sm:$0xff]  ;;  %v763_v12 = vld [vmem:[%s1921_s24 + $0x14] sm:$0xff] }
  0x39   : > { %550 = vmatprep.subr.mxu0 %v1591_v21  ;;  %686 = vmatprep.subr.mxu1 %v1621_v22  ;;  %v761_v10 = vld [vmem:[%s1921_s24 + $0x4] sm:$0xff]  ;;  %v764_v13 = vld [vmem:[%s1921_s24 + $0x1c] sm:$0xf]  ;;  %v2215_v15 = vld [vmem:[%s2629_s4 + $0x70] sm:$0xff] }
  0x3a   : > { %551 = vmatpush1.msra.mxu0 %v1590_v23  ;;  %687 = vmatpush1.msra.mxu1 %v1620_v24  ;;  %v2210_v14 = vld [vmem:[%s2629_s4 + $0x78] sm:$0xff]  ;;  %v2222_v16 = vld [vmem:[%s2629_s4 + $0x68] sm:$0xff]  ;;  %v2229_v17 = vld [vmem:[%s2629_s4 + $0x60] sm:$0xff] }
  0x3b   : > { %377 = vmatprep.mubr.f32.mxu0 %v2631_v50  ;;  %478 = vmatprep.mubr.f32.mxu1 %v2631_v50  ;;  %v2236_v18 = vld [vmem:[%s2629_s4 + $0x58] sm:$0xff]  ;;  %v2243_v19 = vld [vmem:[%s2629_s4 + $0x50] sm:$0xff]  ;;  %v2250_v20 = vld [vmem:[%s2629_s4 + $0x48] sm:$0xff] }
  0x3c   : > { %552 = vmatprep.subr.mxu0 %v1589_v25  ;;  %688 = vmatprep.subr.mxu1 %v1619_v26  ;;  %v2257_v21 = vld [vmem:[%s2629_s4 + $0x40] sm:$0xff]  ;;  %v2264_v22 = vld [vmem:[%s2629_s4 + $0x38] sm:$0xff]  ;;  %v2271_v23 = vld [vmem:[%s2629_s4 + $0x30] sm:$0xff] }
  0x3d   : > { %1579 = vmatmul.mubr.msk.f32.gmra.mxu0 %vm282_vm0, %v256_v27  ;;  %1583 = vmatmul.mubr.msk.f32.gmra.mxu1 %vm282_vm0, %v228_v28  ;;  %v2278_v24 = vld [vmem:[%s2629_s4 + $0x28] sm:$0xff]  ;;  %v2285_v25 = vld [vmem:[%s2629_s4 + $0x20] sm:$0xff]  ;;  %v2292_v26 = vld [vmem:[%s2629_s4 + $0x18] sm:$0xff] }
  0x3e   : > { %553 = vmatpush1.msra.mxu0 %v1588_v29  ;;  %689 = vmatpush1.msra.mxu1 %v1618_v30  ;;  %2642 = vst [vmem:[#allocation2_spill] sm:$0xff] %v2285_v25  ;;  %2643 = vst [vmem:[#allocation3_spill] sm:$0xff] %v2292_v26  ;;  %v2299_v27 = vld [vmem:[%s2629_s4 + $0x10] sm:$0xff]  ;;  %v2306_v28 = vld [vmem:[%s2629_s4 + $0x8] sm:$0xff] }
  0x3f   : > { %554 = vmatprep.subr.mxu0 %v1587_v31  ;;  %690 = vmatprep.subr.mxu1 %v1617_v32  ;;  %2644 = vst [vmem:[#allocation4_spill] sm:$0xff] %v2299_v27  ;;  %2645 = vst [vmem:[#allocation5_spill] sm:$0xff] %v2306_v28  ;;  %v2313_v29 = vld [vmem:[%s2629_s4] sm:$0xff]  ;;  %v2327_v31 = vld [vmem:[%s2629_s4 + $0x98] sm:$0xff] }
  0x40   : > { %555 = vmatpush1.msra.mxu0 %v1586_v33  ;;  %691 = vmatpush1.msra.mxu1 %v1616_v34  ;;  %2646 = vst [vmem:[#allocation6_spill] sm:$0xff] %v2313_v29  ;;  %v2320_v30 = vld [vmem:[%s2629_s4 + $0xa0] sm:$0xff]  ;;  %2648 = vst [vmem:[#allocation8_spill] sm:$0xff] %v2327_v31  ;;  %v2334_v32 = vld [vmem:[%s2629_s4 + $0x90] sm:$0xff] }
  0x41   : > { %556 = vmatprep.subr.mxu0 %v1585_v35  ;;  %692 = vmatprep.subr.mxu1 %v1615_v36  ;;  %2647 = vst [vmem:[#allocation7_spill] sm:$0xff] %v2320_v30  ;;  %2649 = vst [vmem:[#allocation9_spill] sm:$0xff] %v2334_v32 }
  0x42   : > { %557 = vmatpush1.msra.mxu0 %v1584_v37  ;;  %590 = vmatprep.mubr.f32.mxu0 %v2631_v50 }
  0x43   : > { %693 = vmatpush1.msra.mxu1 %v1614_v38  ;;  %1608 = vmatmul.mubr.msk.f32.vlgmr.msra.gmra.mxu0 %vm282_vm0, %v485_v39 }
  0x44   : > { %694 = vmatprep.subr.mxu1 %v1613_v40  ;;  %810 = vmatprep.subr.mxu0 %v1663_v41 }
  0x45   : > { %695 = vmatpush1.msra.mxu1 %v1612_v42  ;;  %728 = vmatprep.mubr.f32.mxu1 %v2631_v50 }
  0x46   : > { %811 = vmatpush1.msra.mxu0 %v1662_v43  ;;  %1636 = vmatmul.mubr.msk.f32.vlgmr.msra.gmra.mxu1 %vm282_vm0, %v623_v44 }
  0x47   : > { %812 = vmatprep.subr.mxu0 %v1661_v45  ;;  %596 = vmatprep.mubr.f32.mxu0 %v2631_v50 }
  0x48   : > { %813 = vmatpush1.msra.mxu0 %v1660_v46  ;;  %734 = vmatprep.mubr.f32.mxu1 %v2631_v50 }
  0x49   : > { %1609 = vmatmul.mubr.msk.f32.gmra.mxu0 %vm282_vm0, %v486_v47  ;;  %814 = vmatprep.subr.mxu0 %v1659_v48 }
  0x4a   : > { %815 = vmatpush1.msra.mxu0 %v1658_v49  ;;  %1637 = vmatmul.mubr.msk.f32.gmra.mxu1 %vm282_vm0, %v624_v51 }
  0x4b   : > { %816 = vmatprep.subr.mxu0 %v1657_v52  ;;  %602 = vmatprep.mubr.f32.mxu0 %v2631_v50 }
  0x4c   : > { %817 = vmatpush1.msra.mxu0 %v1656_v53  ;;  %740 = vmatprep.mubr.f32.mxu1 %v2631_v50 }
  0x4d   : > { %1610 = vmatmul.mubr.msk.f32.gmra.mxu0 %vm282_vm0, %v487_v54  ;;  %818 = vmatprep.subr.mxu0 %v1655_v55 }
  0x4e   : > { %819 = vmatpush1.msra.mxu0 %v1654_v56  ;;  %1638 = vmatmul.mubr.msk.f32.gmra.mxu1 %vm282_vm0, %v625_v57 }
  0x4f   : > { %820 = vmatprep.subr.mxu0 %v1653_v58  ;;  %608 = vmatprep.mubr.f32.mxu0 %v2631_v50 }
  0x50   : > { %821 = vmatpush1.msra.mxu0 %v1652_v59  ;;  %746 = vmatprep.mubr.f32.mxu1 %v2631_v50 }
  0x51   : > { %1611 = vmatmul.mubr.msk.f32.gmra.mxu0 %vm282_vm0, %v488_v60  ;;  %822 = vmatprep.subr.mxu0 %v1651_v61 }
  0x52   : > { %823 = vmatpush1.msra.mxu0 %v1650_v62  ;;  %1639 = vmatmul.mubr.msk.f32.gmra.mxu1 %vm282_vm0, %v626_v63 }
  0x53   : > { %824 = vmatprep.subr.mxu0 %v1649_v0  ;;  %866 = vmatprep.mubr.f32.mxu0 %v2631_v50  ;;  %v901_v0 = vlaneseq }
  0x54   : > { %825 = vmatpush1.msra.mxu0 %v1648_v1  ;;  %1023 = vmatprep.mubr.f32.mxu1 %v2631_v50 }
  0x55   : > { %826 = vmatprep.subr.mxu0 %v1647_v2 }
  0x56   : > { %827 = vmatpush1.msra.mxu0 %v1646_v3 }
  0x57   : > { %828 = vmatprep.subr.mxu0 %v1645_v4 }
  0x58   : > { %829 = vmatpush1.msra.mxu0 %v1644_v5  ;;  %v902_v5 = vshrl.u32 %v901_v0, 7 }
  0x59   : > { %830 = vmatprep.subr.mxu0 %v1643_v6 }
  0x5a   : > { %831 = vmatpush1.msra.mxu0 %v1642_v7 }
  0x5b   : > { %832 = vmatprep.subr.mxu0 %v1641_v8 }
  0x5c   : > { %833 = vmatpush1.msra.mxu0 %v1640_v9 }
  0x5d   : > { %1664 = vmatmul.mubr.msk.f32.vlgmr.msra.gmra.mxu0 %vm282_vm0, %v761_v10  ;;  %1150 = vmatprep.subr.mxu0 %v2631_v50 }
  0x5e   : > { %872 = vmatprep.mubr.f32.mxu0 %v2631_v50  ;;  %1151 = vmatpush1.msra.mxu0 %v2210_v14 }
  0x5f   : > { %1152 = vmatprep.subr.mxu0 %v2631_v50 }
  0x60   : > { %1153 = vmatpush1.msra.mxu0 %v2215_v15 }
  0x61   : > { %1665 = vmatmul.mubr.msk.f32.gmra.mxu0 %vm282_vm0, %v762_v11  ;;  %1154 = vmatprep.subr.mxu0 %v2631_v50 }
  0x62   : > { %878 = vmatprep.mubr.f32.mxu0 %v2631_v50  ;;  %1155 = vmatpush1.msra.mxu0 %v2222_v16 }
  0x63   : > { %1156 = vmatprep.subr.mxu0 %v2631_v50 }
  0x64   : > { %1157 = vmatpush1.msra.mxu0 %v2229_v17 }
  0x65   : > { %1666 = vmatmul.mubr.msk.f32.gmra.mxu0 %vm282_vm0, %v763_v12  ;;  %1158 = vmatprep.subr.mxu0 %v2631_v50 }
  0x66   : > { %884 = vmatprep.mubr.f32.mxu0 %v2631_v50  ;;  %1159 = vmatpush1.msra.mxu0 %v2236_v18 }
  0x67   : > { %1160 = vmatprep.subr.mxu0 %v2631_v50 }
  0x68   : > { %1161 = vmatpush1.msra.mxu0 %v2243_v19 }
  0x69   : > { %1667 = vmatmul.mubr.msk.f32.gmra.mxu0 %vm282_vm0, %v764_v13  ;;  %1162 = vmatprep.subr.mxu0 %v2631_v50 }
  0x6a   : > { %1163 = vmatpush1.msra.mxu0 %v2250_v20 }
  0x6b   : > { %1164 = vmatprep.subr.mxu0 %v2631_v50 }
  0x6c   : > { %1165 = vmatpush1.msra.mxu0 %v2257_v21 }
  0x6d   : > { %1166 = vmatprep.subr.mxu0 %v2631_v50 }
  0x6e   : > { %1167 = vmatpush1.msra.mxu0 %v2264_v22 }
  0x6f   : > { %1168 = vmatprep.subr.mxu0 %v2631_v50 }
  0x70   : > { %1169 = vmatpush1.msra.mxu0 %v2271_v23 }
  0x71   : > { %1170 = vmatprep.subr.mxu0 %v2631_v50 }
  0x72   : > { %1171 = vmatpush1.msra.mxu0 %v2278_v24 }
  0x73   : > { %1172 = vmatprep.subr.mxu0 %v2631_v50 }
  0x74   : > { %1173 = vmatpush1.msra.mxu0 %v2285_v25 }
  0x75   : > { %1174 = vmatprep.subr.mxu0 %v2631_v50 }
  0x76   : > { %1175 = vmatpush1.msra.mxu0 %v2292_v26  ;;  %v903_v26 = vsub.s32 0, %v902_v5 }
  0x77   : > { %1176 = vmatprep.subr.mxu0 %v2631_v50 }
  0x78   : > { %1177 = vmatpush1.msra.mxu0 %v2299_v27 }
  0x79   : > { %1178 = vmatprep.subr.mxu0 %v2631_v50 }
  0x7a   : > { %1179 = vmatpush1.msra.mxu0 %v2306_v28 }
  0x7b   : > { %1180 = vmatprep.subr.mxu0 %v2631_v50 }
  0x7c   : > { %1181 = vmatpush1.msra.mxu0 %v2313_v29 }
  0x7d   : > { %1204 = vmatprep.subr.mxu0 %v2631_v50 }
  0x7e   : > { %1205 = vmatpush2.msra.mxu0 %v2320_v30 }
  0x7f   : > { %1206 = vmatprep.subr.mxu0 %v2631_v50 }
  0x80   : > { %1207 = vmatpush2.msra.mxu0 %v2327_v31 }
  0x81   : > { %1208 = vmatprep.subr.mxu0 %v2631_v50 }
  0x82   : > { %1209 = vmatpush2.msra.mxu0 %v2334_v32 }
  0x83   : > { %1210 = vmatprep.subr.mxu0 %v2631_v50 }
  0xe5   : > { %v361_v33 = vpop.f32.mrf.mxu0  ;;  %v462_v34 = vpop.f32.mrf.mxu1 }
  0xe6   : > { %v463_v29 = vadd.f32 %v462_v34, %v361_v33 }
  0xe7   : > { %v363_v35 = vpop.f32.mrf.mxu0  ;;  %v464_v37 = vpop.f32.mrf.mxu1 }
  0xe8   : > { %v465_v10 = vadd.f32 %v464_v37, %v363_v35 }
  0xf1   : > { %v367_v36 = vpop.f32.mrf.mxu0  ;;  %v468_v39 = vpop.f32.mrf.mxu1 }
  0xf2   : > { %v469_v11 = vadd.f32 %v468_v39, %v367_v36 }
  0xf3   : > { %v369_v38 = vpop.f32.mrf.mxu0  ;;  %v470_v41 = vpop.f32.mrf.mxu1 }
  0xf4   : > { %v471_v7 = vadd.f32 %v470_v41, %v369_v38  ;;  %v899_v38 = vld [vmem:[%s2627_s2] sm:$0x3]  ;;  %v907_v41 = vsub.s32 1, %v902_v5 }
  0xf5   : > { %v904_v34 = vrot.slane %v899_v38, %v903_v26 }
  0xf7   : > { %v373_v40 = vpop.f32.mrf.mxu0  ;;  %v474_v43 = vpop.f32.mrf.mxu1 }
  0xf8   : > { %v475_v4 = vadd.f32 %v474_v43, %v373_v40 }
  0xf9   : > { %v375_v42 = vpop.f32.mrf.mxu0  ;;  %v476_v46 = vpop.f32.mrf.mxu1 }
  0xfa   : > { %v477_v3 = vadd.f32 %v476_v46, %v375_v42 }
  0xfd   : > { %v379_v44 = vpop.f32.mrf.mxu0  ;;  %v480_v48 = vpop.f32.mrf.mxu1 }
  0xfe   : > { %v481_v8 = vadd.f32 %v480_v48, %v379_v44 }
  0xff   : > { %v381_v45 = vpop.f32.mrf.mxu0  ;;  %v482_v51 = vpop.f32.mrf.mxu1 }
 0x100   : > { %v483_v32 = vadd.f32 %v482_v51, %v381_v45 }
 0x103   : > { %v592_v47 = vpop.f32.mrf.mxu0 }
 0x104   : > { %v615_v35 = vadd.f32 %v592_v47, %v463_v29 }
 0x105   : > { %v594_v49 = vpop.f32.mrf.mxu0 }
 0x106   : > { %v730_v53 = vpop.f32.mrf.mxu1  ;;  %v616_v28 = vadd.f32 %v594_v49, %v465_v10  ;;  %v943_v10 = vld [vmem:[%s2628_s3] sm:$0xff] }
 0x108   : > { %v732_v55 = vpop.f32.mrf.mxu1 }
 0x109   : > { %v598_v52 = vpop.f32.mrf.mxu0  ;;  %v754_v46 = vadd.f32 %v732_v55, %v616_v28 }
 0x10a   : > { %v736_v57 = vpop.f32.mrf.mxu1  ;;  %v617_v27 = vadd.f32 %v598_v52, %v469_v11  ;;  %v908_v52 = vrot.slane %v899_v38, %v907_v41  ;;  %v2370_v38 = vld [vmem:[%s2629_s4 + $0x118] sm:$0xff] }
 0x10b   : > { %v600_v54 = vpop.f32.mrf.mxu0  ;;  %v1673_v41 = vld [vmem:[%s2628_s3 + $0x18] sm:$0x3f] }
 0x10c   : > { %v738_v59 = vpop.f32.mrf.mxu1  ;;  %v618_v31 = vadd.f32 %v600_v54, %v471_v7  ;;  %v755_v33 = vadd.f32 %v736_v57, %v617_v27 }
 0x10d   : > { %v604_v56 = vpop.f32.mrf.mxu0 }
 0x10e   : > { %v742_v61 = vpop.f32.mrf.mxu1  ;;  %v619_v12 = vadd.f32 %v604_v56, %v475_v4  ;;  %v756_v43 = vadd.f32 %v738_v59, %v618_v31  ;;  %v753_v56 = vadd.f32 %v730_v53, %v615_v35  ;;  %v2381_v35 = vld [vmem:[%s2629_s4 + $0x110] sm:$0xff] }
 0x10f   : > { %v606_v58 = vpop.f32.mrf.mxu0 }
 0x110   : > { %v744_v1 = vpop.f32.mrf.mxu1  ;;  %v620_v9 = vadd.f32 %v606_v58, %v477_v3  ;;  %v757_v36 = vadd.f32 %v742_v61, %v619_v12  ;;  %v2650_v12 = vmov 0.0  }
 0x111   : > { %v610_v60 = vpop.f32.mrf.mxu0 }
 0x112   : > { %v748_v13 = vpop.f32.mrf.mxu1  ;;  %v621_v30 = vadd.f32 %v610_v60, %v481_v8  ;;  %v758_v42 = vadd.f32 %v744_v1, %v620_v9 }
 0x113   : > { %v612_v62 = vpop.f32.mrf.mxu0 }
 0x114   : > { %v622_v40 = vadd.f32 %v612_v62, %v483_v32  ;;  %v750_v37 = vpop.f32.mrf.mxu1  ;;  %v759_v44 = vadd.f32 %v748_v13, %v621_v30  ;;  %v944_v13 = vld [vmem:[%s2628_s3 + $0x8] sm:$0x3f] }
 0x116   : > { %v760_v51 = vadd.f32 %v750_v37, %v622_v40  ;;  %v2363_v40 = vld [vmem:[%s2629_s4 + $0x120] sm:$0xff] }
 0x117   : > { %v2396_v37 = vld [vmem:[%s2629_s4 + $0x100] sm:$0xff] }
 0x11d   : > { %v868_v63 = vpop.f32.mrf.mxu0 }
 0x11e   : > { %v891_v0 = vadd.f32 %v868_v63, %v753_v56  ;;  %v2494_v56 = vld [vmem:[%s2629_s4 + $0x138] sm:$0xff] }
 0x11f   : > { %v870_v2 = vpop.f32.mrf.mxu0 }
 0x120   : > { %v892_v58 = vadd.f32 %v870_v2, %v754_v46  ;;  %v911_v55 = vadd.f32 %v904_v34, %v891_v0  ;;  %v2431_v46 = vld [vmem:[%s2629_s4 + $0xd8] sm:$0xff] }
 0x121   : > { %v874_v6 = vpop.f32.mrf.mxu0  ;;  %v2658_v0 = vld [vmem:[#allocation9_spill] sm:$0xff] }
 0x122   : > { %v893_v60 = vadd.f32 %v874_v6, %v755_v33  ;;  %v912_v28 = vadd.f32 %v908_v52, %v892_v58  ;;  %v927_v5 = vmul.f32 0.01, %v911_v55  ;;  %vm919_vm9 = vcmp.gt.f32.partialorder %v911_v55, 0.0  ;;  %v2438_v33 = vld [vmem:[%s2629_s4 + $0xd0] sm:$0xff]  ;;  %v2503_v58 = vld [vmem:[%s2629_s4 + $0x88] sm:$0xff] }
 0x123   : > { %v876_v50 = vpop.f32.mrf.mxu0  ;;  %1211 = vmatpush2.msra.mxu0 %v2503_v58 }
 0x124   : > { %v894_v32 = vadd.f32 %v876_v50, %v756_v43  ;;  %v913_v27 = vadd.f32 %v904_v34, %v893_v60  ;;  %v928_v4 = vmul.f32 0.01, %v912_v28  ;;  %vm920_vm8 = vcmp.gt.f32.partialorder %v912_v28, 0.0  ;;  %v2410_v43 = vld [vmem:[%s2629_s4 + $0xf0] sm:$0xff]  ;;  %1212 = vmatprep.subr.mxu0 %v2650_v12 }
 0x125   : > { %v880_v25 = vpop.f32.mrf.mxu0  ;;  %v935_v11 = vsel %vm919_vm9, %v911_v55, %v927_v5  ;;  %v2508_v60 = vld [vmem:[%s2629_s4 + $0x130] sm:$0xff] }
 0x126   : > { %v895_v48 = vadd.f32 %v880_v25, %v757_v36  ;;  %v914_v30 = vadd.f32 %v908_v52, %v894_v32  ;;  %v929_v2 = vmul.f32 0.01, %v913_v27  ;;  %vm921_vm7 = vcmp.gt.f32.partialorder %v913_v27, 0.0  ;;  %v2389_v36 = vld [vmem:[%s2629_s4 + $0x108] sm:$0xff] }
 0x127   : > { %v882_v39 = vpop.f32.mrf.mxu0  ;;  %v936_v9 = vsel %vm920_vm8, %v912_v28, %v928_v4  ;;  %v2480_v32 = vld [vmem:[%s2629_s4 + $0x148] sm:$0xff] }
 0x128   : > { %v896_v45 = vadd.f32 %v882_v39, %v758_v42  ;;  %v915_v31 = vadd.f32 %v904_v34, %v895_v48  ;;  %v930_v1 = vmul.f32 0.01, %v914_v30  ;;  %vm922_vm6 = vcmp.gt.f32.partialorder %v914_v30, 0.0  ;;  %v1672_v42 = vld [vmem:[%s2628_s3 + $0x10] sm:$0xff]  ;;  %v2403_v39 = vld [vmem:[%s2629_s4 + $0xf8] sm:$0xff]  ;;  %v2452_v48 = vld [vmem:[%s2629_s4 + $0xc0] sm:$0xff] }
 0x129   : > { %v886_v49 = vpop.f32.mrf.mxu0  ;;  %v937_v8 = vsel %vm921_vm7, %v913_v27, %v929_v2 }
 0x12a   : > { %v897_v54 = vadd.f32 %v886_v49, %v759_v44  ;;  %v916_v29 = vadd.f32 %v908_v52, %v896_v45  ;;  %v931_v53 = vmul.f32 0.01, %v915_v31  ;;  %vm923_vm5 = vcmp.gt.f32.partialorder %v915_v31, 0.0  ;;  %v2417_v44 = vld [vmem:[%s2629_s4 + $0xe8] sm:$0xff]  ;;  %v2424_v45 = vld [vmem:[%s2629_s4 + $0xe0] sm:$0xff]  ;;  %v2459_v49 = vld [vmem:[%s2629_s4 + $0xb8] sm:$0xff] }
 0x12b   : > { %v888_v62 = vpop.f32.mrf.mxu0  ;;  %v938_v7 = vsel %vm922_vm6, %v914_v30, %v930_v1 }
 0x12c   : > { %v917_v47 = vadd.f32 %v904_v34, %v897_v54  ;;  %v898_v61 = vadd.f32 %v888_v62, %v760_v51  ;;  %v932_v50 = vmul.f32 0.01, %v916_v29  ;;  %vm924_vm4 = vcmp.gt.f32.partialorder %v916_v29, 0.0  ;;  %v2445_v34 = vld [vmem:[%s2629_s4 + $0xc8] sm:$0xff]  ;;  %v2466_v51 = vld [vmem:[%s2629_s4 + $0xb0] sm:$0xff]  ;;  %v2487_v54 = vld [vmem:[%s2629_s4 + $0x140] sm:$0xff] }
 0x12d   : > { %v939_v6 = vsel %vm923_vm5, %v915_v31, %v931_v53  ;;  %v2517_v62 = vld [vmem:[%s2629_s4 + $0x80] sm:$0xff] }
 0x12e   : > { %v918_v59 = vadd.f32 %v908_v52, %v898_v61  ;;  %v933_v26 = vmul.f32 0.01, %v917_v47  ;;  %vm925_vm2 = vcmp.gt.f32.partialorder %v917_v47, 0.0  ;;  %v940_v3 = vsel %vm924_vm4, %v916_v29, %v932_v50  ;;  %v2473_v52 = vld [vmem:[%s2629_s4 + $0xa8] sm:$0xff]  ;;  %1213 = vmatpush2.msra.mxu0 %v2517_v62 }
 0x12f   : > { %v2522_v29 = vld [vmem:[%s2629_s4 + $0x128] sm:$0xff]  ;;  %1330 = vmatprep.subr.mxu0 %v2650_v12 }
 0x130   : > { %v934_v25 = vmul.f32 0.01, %v918_v59  ;;  %vm926_vm3 = vcmp.gt.f32.partialorder %v918_v59, 0.0  ;;  %v941_v63 = vsel %vm925_vm2, %v917_v47, %v933_v26 }
 0x132   : > { %v942_v57 = vsel %vm926_vm3, %v918_v59, %v934_v25 }
 0x133   : > { %1668 = vmatprep.subr.msk.mxu1 %vm952_vm1, %v942_v57 }
 0x134   : > { %1669 = vmatpush1.msk.msra.mxu1 %vm952_vm1, %v941_v63 }
 0x135   : > { %985 = vmatprep.subr.mxu1 %v940_v3 }
 0x136   : > { %986 = vmatpush1.msra.mxu1 %v939_v6 }
 0x137   : > { %987 = vmatprep.subr.mxu1 %v938_v7 }
 0x138   : > { %988 = vmatpush1.msra.mxu1 %v937_v8 }
 0x139   : > { %989 = vmatprep.subr.mxu1 %v936_v9 }
 0x13a   : > { %990 = vmatpush1.msra.mxu1 %v935_v11 }
 0x13b   : > { %1670 = vmatmul.mubr.msk.f32.vlgmr.msra.gmra.mxu1 %vm945_vm10, %v943_v10  ;;  %1674 = vmatprep.subr.msk.mxu1 %vm952_vm1, %v942_v57 }
 0x13c   : > { %1675 = vmatpush1.msk.msra.mxu1 %vm952_vm1, %v941_v63  ;;  %1029 = vmatprep.mubr.f32.mxu1 %v2650_v12 }
 0x13d   : > { %1071 = vmatprep.subr.mxu1 %v940_v3 }
 0x13e   : > { %1072 = vmatpush1.msra.mxu1 %v939_v6 }
 0x13f   : > { %1073 = vmatprep.subr.mxu1 %v938_v7  ;;  %1671 = vmatmul.mubr.msk.f32.gmra.mxu1 %vm945_vm10, %v944_v13 }
 0x140   : > { %1074 = vmatpush1.msra.mxu1 %v937_v8  ;;  %1109 = vmatprep.mubr.f32.mxu1 %v2650_v12 }
 0x141   : > { %1075 = vmatprep.subr.mxu1 %v936_v9 }
 0x142   : > { %1076 = vmatpush1.msra.mxu1 %v935_v11 }
 0x143   : > { %1676 = vmatmul.mubr.msk.f32.vlgmr.msra.gmra.mxu1 %vm945_vm10, %v1672_v42  ;;  %1247 = vmatprep.subr.mxu1 %v2650_v12 }
 0x144   : > { %1115 = vmatprep.mubr.f32.mxu1 %v2650_v12  ;;  %1248 = vmatpush1.msra.mxu1 %v2363_v40 }
 0x145   : > { %1249 = vmatprep.subr.mxu1 %v2650_v12 }
 0x146   : > { %1250 = vmatpush1.msra.mxu1 %v2370_v38 }
 0x147   : > { %1677 = vmatmul.mubr.msk.f32.gmra.mxu1 %vm945_vm10, %v1673_v41  ;;  %1251 = vmatprep.subr.mxu1 %v2650_v12 }
 0x148   : > { %1252 = vmatpush1.msra.mxu1 %v2381_v35 }
 0x149   : > { %1253 = vmatprep.subr.mxu1 %v2650_v12 }
 0x14a   : > { %1254 = vmatpush1.msra.mxu1 %v2389_v36 }
 0x14b   : > { %1255 = vmatprep.subr.mxu1 %v2650_v12 }
 0x14c   : > { %1256 = vmatpush1.msra.mxu1 %v2396_v37 }
 0x14d   : > { %1257 = vmatprep.subr.mxu1 %v2650_v12 }
 0x14e   : > { %1258 = vmatpush1.msra.mxu1 %v2403_v39 }
 0x14f   : > { %1259 = vmatprep.subr.mxu1 %v2650_v12 }
 0x150   : > { %1260 = vmatpush1.msra.mxu1 %v2410_v43 }
 0x151   : > { %1261 = vmatprep.subr.mxu1 %v2650_v12 }
 0x152   : > { %1262 = vmatpush1.msra.mxu1 %v2417_v44 }
 0x153   : > { %1263 = vmatprep.subr.mxu1 %v2650_v12 }
 0x154   : > { %1264 = vmatpush1.msra.mxu1 %v2424_v45 }
 0x155   : > { %1265 = vmatprep.subr.mxu1 %v2650_v12 }
 0x156   : > { %1266 = vmatpush1.msra.mxu1 %v2431_v46 }
 0x157   : > { %1267 = vmatprep.subr.mxu1 %v2650_v12 }
 0x158   : > { %1268 = vmatpush1.msra.mxu1 %v2438_v33 }
 0x159   : > { %1269 = vmatprep.subr.mxu1 %v2650_v12 }
 0x15a   : > { %1270 = vmatpush1.msra.mxu1 %v2445_v34 }
 0x15b   : > { %1271 = vmatprep.subr.mxu1 %v2650_v12 }
 0x15c   : > { %1272 = vmatpush1.msra.mxu1 %v2452_v48 }
 0x15d   : > { %1273 = vmatprep.subr.mxu1 %v2650_v12 }
 0x15e   : > { %1274 = vmatpush1.msra.mxu1 %v2459_v49 }
 0x15f   : > { %1275 = vmatprep.subr.mxu1 %v2650_v12 }
 0x160   : > { %1276 = vmatpush1.msra.mxu1 %v2466_v51 }
 0x161   : > { %1277 = vmatprep.subr.mxu1 %v2650_v12 }
 0x162   : > { %1278 = vmatpush1.msra.mxu1 %v2473_v52 }
 0x163   : > { %1301 = vmatprep.subr.mxu1 %v2650_v12 }
 0x164   : > { %1302 = vmatpush2.msra.mxu1 %v2480_v32 }
 0x165   : > { %1303 = vmatprep.subr.mxu1 %v2650_v12 }
 0x166   : > { %1304 = vmatpush2.msra.mxu1 %v2487_v54 }
 0x167   : > { %1305 = vmatprep.subr.mxu1 %v2650_v12 }
 0x168   : > { %1306 = vmatpush2.msra.mxu1 %v2494_v56 }
 0x169   : > { %1307 = vmatprep.subr.mxu1 %v2650_v12 }
 0x16a   : > { %1308 = vmatpush2.msra.mxu1 %v2508_v60 }
 0x16b   : > { %1309 = vmatprep.subr.mxu1 %v2650_v12 }
 0x16c   : > { %1310 = vmatpush2.msra.mxu1 %v2522_v29 }
 0x16d   : > { %1405 = vmatprep.subr.mxu1 %v2650_v12 }
 0x1fb   : > { %v1025_v47 = vpop.f32.mrf.mxu1 }
 0x1fd   : > { %v1027_v61 = vpop.f32.mrf.mxu1 }
 0x1fe   : > { %1678 = vmatprep.mubr.msk.f32.mxu0 %vm1143_vm11, %v1027_v61  ;;  %1701 = vmatprep.mubr.msk.f32.mxu1 %vm1143_vm11, %v1027_v61 }
 0x1ff   : > { %1215 = vmatmul.mubr.f32.vlgmr.msra.gmra.mxu0 %v1025_v47  ;;  %1312 = vmatmul.mubr.f32.vlgmr.msra.gmra.mxu1 %v1025_v47 }
 0x200   : > { %1331 = vmatpush1.msra.mxu0 %v2210_v14  ;;  %1406 = vmatpush1.msra.mxu1 %v2363_v40  ;;  %v2651_v14 = vld [vmem:[#allocation2_spill] sm:$0xff] }
 0x201   : > { %1332 = vmatprep.subr.mxu0 %v2650_v12  ;;  %1407 = vmatprep.subr.mxu1 %v2650_v12 }
 0x202   : > { %1333 = vmatpush1.msra.mxu0 %v2215_v15  ;;  %1408 = vmatpush1.msra.mxu1 %v2370_v38  ;;  %v2652_v15 = vld [vmem:[#allocation3_spill] sm:$0xff] }
 0x203   : > { %1334 = vmatprep.subr.mxu0 %v2650_v12  ;;  %1409 = vmatprep.subr.mxu1 %v2650_v12 }
 0x204   : > { %1335 = vmatpush1.msra.mxu0 %v2222_v16  ;;  %1410 = vmatpush1.msra.mxu1 %v2381_v35  ;;  %v1031_v16 = vpop.f32.mrf.mxu1 }
 0x205   : > { %1336 = vmatprep.subr.mxu0 %v2650_v12  ;;  %1411 = vmatprep.subr.mxu1 %v2650_v12 }
 0x206   : > { %1337 = vmatpush1.msra.mxu0 %v2229_v17  ;;  %1412 = vmatpush1.msra.mxu1 %v2389_v36  ;;  %v2653_v17 = vld [vmem:[#allocation4_spill] sm:$0xff] }
 0x207   : > { %1338 = vmatprep.subr.mxu0 %v2650_v12  ;;  %1413 = vmatprep.subr.mxu1 %v2650_v12 }
 0x208   : > { %1339 = vmatpush1.msra.mxu0 %v2236_v18  ;;  %1414 = vmatpush1.msra.mxu1 %v2396_v37  ;;  %v2654_v18 = vld [vmem:[#allocation5_spill] sm:$0xff] }
 0x209   : > { %1340 = vmatprep.subr.mxu0 %v2650_v12  ;;  %1415 = vmatprep.subr.mxu1 %v2650_v12 }
 0x20a   : > { %1341 = vmatpush1.msra.mxu0 %v2243_v19  ;;  %1416 = vmatpush1.msra.mxu1 %v2403_v39  ;;  %v1033_v19 = vpop.f32.mrf.mxu1 }
 0x20b   : > { %1342 = vmatprep.subr.mxu0 %v2650_v12  ;;  %1417 = vmatprep.subr.mxu1 %v2650_v12 }
 0x20c   : > { %1343 = vmatpush1.msra.mxu0 %v2250_v20  ;;  %1418 = vmatpush1.msra.mxu1 %v2410_v43  ;;  %v2655_v20 = vld [vmem:[#allocation6_spill] sm:$0xff] }
 0x20d   : > { %1344 = vmatprep.subr.mxu0 %v2650_v12  ;;  %1419 = vmatprep.subr.mxu1 %v2650_v12 }
 0x20e   : > { %1345 = vmatpush1.msra.mxu0 %v2257_v21  ;;  %1420 = vmatpush1.msra.mxu1 %v2417_v44  ;;  %v1111_v21 = vpop.f32.mrf.mxu1 }
 0x20f   : > { %1346 = vmatprep.subr.mxu0 %v2650_v12  ;;  %1421 = vmatprep.subr.mxu1 %v2650_v12 }
 0x210   : > { %1347 = vmatpush1.msra.mxu0 %v2264_v22  ;;  %1422 = vmatpush1.msra.mxu1 %v2424_v45  ;;  %v2656_v22 = vld [vmem:[#allocation7_spill] sm:$0xff] }
 0x211   : > { %1348 = vmatprep.subr.mxu0 %v2650_v12  ;;  %1423 = vmatprep.subr.mxu1 %v2650_v12 }
 0x212   : > { %1349 = vmatpush1.msra.mxu0 %v2271_v23  ;;  %1424 = vmatpush1.msra.mxu1 %v2431_v46  ;;  %v2657_v23 = vld [vmem:[#allocation8_spill] sm:$0xff] }
 0x213   : > { %1350 = vmatprep.subr.mxu0 %v2650_v12  ;;  %1425 = vmatprep.subr.mxu1 %v2650_v12 }
 0x214   : > { %1351 = vmatpush1.msra.mxu0 %v2278_v24  ;;  %1426 = vmatpush1.msra.mxu1 %v2438_v33  ;;  %v1113_v24 = vpop.f32.mrf.mxu1 }
 0x215   : > { %1352 = vmatprep.subr.mxu0 %v2650_v12  ;;  %1427 = vmatprep.subr.mxu1 %v2650_v12 }
 0x216   : > { %1353 = vmatpush1.msra.mxu0 %v2651_v14  ;;  %1428 = vmatpush1.msra.mxu1 %v2445_v34  ;;  %v1117_v31 = vpop.f32.mrf.mxu1 }
 0x217   : > { %1354 = vmatprep.subr.mxu0 %v2650_v12  ;;  %1429 = vmatprep.subr.mxu1 %v2650_v12 }
 0x218   : > { %1355 = vmatpush1.msra.mxu0 %v2652_v15  ;;  %1430 = vmatpush1.msra.mxu1 %v2452_v48  ;;  %v1119_v30 = vpop.f32.mrf.mxu1 }
 0x219   : > { %1356 = vmatprep.subr.mxu0 %v2650_v12  ;;  %1431 = vmatprep.subr.mxu1 %v2650_v12 }
 0x21a   : > { %1357 = vmatpush1.msra.mxu0 %v2653_v17  ;;  %1432 = vmatpush1.msra.mxu1 %v2459_v49 }
 0x21b   : > { %1358 = vmatprep.subr.mxu0 %v2650_v12  ;;  %1433 = vmatprep.subr.mxu1 %v2650_v12 }
 0x21c   : > { %1359 = vmatpush1.msra.mxu0 %v2654_v18  ;;  %1434 = vmatpush1.msra.mxu1 %v2466_v51 }
 0x21d   : > { %1360 = vmatprep.subr.mxu0 %v2650_v12  ;;  %1435 = vmatprep.subr.mxu1 %v2650_v12 }
 0x21e   : > { %1361 = vmatpush1.msra.mxu0 %v2655_v20  ;;  %1436 = vmatpush1.msra.mxu1 %v2473_v52 }
 0x21f   : > { %1384 = vmatprep.subr.mxu0 %v2650_v12  ;;  %1459 = vmatprep.subr.mxu1 %v2650_v12 }
 0x220   : > { %1385 = vmatpush2.msra.mxu0 %v2656_v22  ;;  %1460 = vmatpush2.msra.mxu1 %v2480_v32 }
 0x221   : > { %1386 = vmatprep.subr.mxu0 %v2650_v12  ;;  %1461 = vmatprep.subr.mxu1 %v2650_v12 }
 0x222   : > { %1387 = vmatpush2.msra.mxu0 %v2657_v23  ;;  %1462 = vmatpush2.msra.mxu1 %v2487_v54 }
 0x223   : > { %1388 = vmatprep.subr.mxu0 %v2650_v12  ;;  %1463 = vmatprep.subr.mxu1 %v2650_v12 }
 0x224   : > { %1679 = vmatprep.mubr.msk.f32.mxu0 %vm1143_vm11, %v1033_v19  ;;  %1702 = vmatprep.mubr.msk.f32.mxu1 %vm1143_vm11, %v1033_v19 }
 0x225   : > { %1389 = vmatpush2.msra.mxu0 %v2658_v0  ;;  %1464 = vmatpush2.msra.mxu1 %v2494_v56 }
 0x226   : > { %1220 = vmatmul.mubr.f32.gmra.mxu0 %v1031_v16  ;;  %1317 = vmatmul.mubr.f32.gmra.mxu1 %v1031_v16 }
 0x227   : > { %1390 = vmatprep.subr.mxu0 %v2650_v12  ;;  %1465 = vmatprep.subr.mxu1 %v2650_v12 }
 0x228   : > { %1391 = vmatpush2.msra.mxu0 %v2503_v58  ;;  %1466 = vmatpush2.msra.mxu1 %v2508_v60 }
 0x229   : > { %1392 = vmatprep.subr.mxu0 %v2650_v12  ;;  %1467 = vmatprep.subr.mxu1 %v2650_v12 }
 0x22a   : > { %1393 = vmatpush2.msra.mxu0 %v2517_v62  ;;  %1703 = vmatprep.mubr.msk.f32.mxu0 %vm1143_vm11, %v1113_v24 }
 0x22b   : > { %1468 = vmatpush2.msra.mxu1 %v2522_v29  ;;  %1705 = vmatprep.mubr.msk.f32.mxu1 %vm1143_vm11, %v1113_v24 }
 0x22c   : > { %1395 = vmatmul.mubr.f32.vlgmr.msra.gmra.mxu0 %v1111_v21  ;;  %1470 = vmatmul.mubr.f32.vlgmr.msra.gmra.mxu1 %v1111_v21 }
 0x22d   : > { %1704 = vmatprep.mubr.msk.f32.mxu0 %vm1143_vm11, %v1119_v30  ;;  %1706 = vmatprep.mubr.msk.f32.mxu1 %vm1143_vm11, %v1119_v30 }
 0x230   : > { %1400 = vmatmul.mubr.f32.gmra.mxu0 %v1117_v31  ;;  %1475 = vmatmul.mubr.f32.gmra.mxu1 %v1117_v31 }
 0x2bf   : > { %v1216_v59 = vpop.f32.mrf.mxu0  ;;  %v1313_v28 = vpop.f32.mrf.mxu1 }
 0x2c0   : > { %v1322_v2 = vmax.f32 %v1216_v59, %v1313_v28 }
 0x2c1   : > { %v1218_v27 = vpop.f32.mrf.mxu0  ;;  %v1315_v26 = vpop.f32.mrf.mxu1 }
 0x2e6   : > { %v1221_v25 = vpop.f32.mrf.mxu0  ;;  %v1318_v50 = vpop.f32.mrf.mxu1 }
 0x2e7   : > { %v1323_v8 = vmax.f32 %v1221_v25, %v1318_v50 }
 0x2e8   : > { %v1223_v55 = vpop.f32.mrf.mxu0  ;;  %v1320_v53 = vpop.f32.mrf.mxu1 }
 0x2ec   : > { %v1396_v57 = vpop.f32.mrf.mxu0  ;;  %v1471_v1 = vpop.f32.mrf.mxu1 }
 0x2ed   : > { %v1480_v63 = vmax.f32 %v1396_v57, %v1471_v1 }
 0x2ee   : > { %v1398_v3 = vpop.f32.mrf.mxu0  ;;  %v1473_v4 = vpop.f32.mrf.mxu1 }
 0x2ef   : > { %v1482_v5 = vmax.f32 %v1322_v2, %v1480_v63 }
 0x2f0   : > { %v1401_v6 = vpop.f32.mrf.mxu0  ;;  %v1476_v7 = vpop.f32.mrf.mxu1 }
 0x2f1   : > { %1485 = vst.msk [vmem:[%s224_s23] sm:$0xff] %vm1484_vm12, %v1482_v5  ;;  %v1481_v9 = vmax.f32 %v1401_v6, %v1476_v7 }
 0x2f2   : > { %v1403_v10 = vpop.f32.mrf.mxu0  ;;  %v1478_v11 = vpop.f32.mrf.mxu1 }
 0x2f3   : > { %v1483_v12 = vmax.f32 %v1323_v8, %v1481_v9 }
 0x2f5   : > { %1487 = vst.msk [vmem:[%s224_s23 + $0x8] sm:$0x3f] %vm1486_vm13, %v1483_v12 }
 0x2f6 PF: > { %s15_s18 = sadd.s32 1, %s1726_s18  }
 0x2f7   : > { %p12_p4 = scmp.ge.s32.totalorder %s15_s18, 4  }
 0x2f9   :  { %14 = sbr.rel (!%p12_p4) target bundleno = 1 (0x1), region = 76 }

// kernel: net_forward.5
= control target key start
LH: loop header
LB: loop body
LE: loop exit
PB: predicated region body
PF: predicated region fallthrough
CT: control target
= control target key end

     0   :  { %v618_v3 = vmov 0.0   ;;  %v619_v23 = vmov 1983009808   ;;  %v90_v25 = vlaneseq  ;;  %s951_s0 = inlined_call_operand.vmem [shape: f32[2,400], index: 0, kind: input, shape index: {}]   ;;  %s952_s1 = inlined_call_operand.vmem [shape: f32[400,120], index: 1, kind: input, shape index: {}]   ;;  %s953_s2 = inlined_call_operand.vmem [shape: f32[1,120], index: 2, kind: input, shape index: {}]   ;;  %s954_s3 = inlined_call_operand.vmem [shape: f32[120,84], index: 3, kind: input, shape index: {}]   ;;  %s955_s4 = inlined_call_operand.vmem [shape: f32[1,84], index: 4, kind: input, shape index: {}]   ;;  %s956_s5 = inlined_call_operand.vmem [shape: f32[84,10], index: 5, kind: input, shape index: {}]   ;;  %s957_s6 = inlined_call_operand.vmem [shape: f32[1,10], index: 6, kind: input, shape index: {}]   ;;  %s958_s7 = inlined_call_operand.hbm [shape: f32[2,10], index: 7, kind: output, shape index: {}]  }
   0x1   :  { %v59_v0 = vld [vmem:[%s952_s1 + $0xf8] sm:$0xff]  ;;  %179 = vmatprep.subr.mxu1 %v618_v3  ;;  %v58_v4 = vld [vmem:[%s952_s1 + $0xf0] sm:$0xff]  ;;  %v57_v7 = vld [vmem:[%s952_s1 + $0xe8] sm:$0xff]  ;;  %v88_v24 = vunpack.c.l.s4 %v619_v23 }
   0x2   :  { %v43_v1 = vld [vmem:[%s952_s1 + $0x78] sm:$0xff]  ;;  %470 = vmatprep.subr.mxu0 %v59_v0  ;;  %v42_v5 = vld [vmem:[%s952_s1 + $0x70] sm:$0xff]  ;;  %v41_v8 = vld [vmem:[%s952_s1 + $0x68] sm:$0xff]  ;;  %v91_v33 = vshrl.u32 %v90_v25, 7 }
   0x3   :  { %v75_v2 = vld [vmem:[%s952_s1 + $0x178] sm:$0xff]  ;;  %v74_v6 = vld [vmem:[%s952_s1 + $0x170] sm:$0xff]  ;;  %471 = vmatpush3.msra.mxu0 %v43_v1  ;;  %v73_v9 = vld [vmem:[%s952_s1 + $0x168] sm:$0xff]  ;;  %v89_v32 = vunpack.c.0.s8 %v88_v24 }
   0x4   :  { %180 = vmatpush1.msra.mxu1 %v75_v2  ;;  %472 = vmatprep.subr.mxu0 %v58_v4  ;;  %v56_v10 = vld [vmem:[%s952_s1 + $0xe0] sm:$0xff]  ;;  %v55_v13 = vld [vmem:[%s952_s1 + $0xd8] sm:$0xff]  ;;  %v54_v16 = vld [vmem:[%s952_s1 + $0xd0] sm:$0xff] }
   0x5   :  { %181 = vmatprep.subr.mxu1 %v618_v3  ;;  %473 = vmatpush3.msra.mxu0 %v42_v5  ;;  %v40_v11 = vld [vmem:[%s952_s1 + $0x60] sm:$0xff]  ;;  %v39_v14 = vld [vmem:[%s952_s1 + $0x58] sm:$0xff]  ;;  %v38_v17 = vld [vmem:[%s952_s1 + $0x50] sm:$0xff]  ;;  %v92_v40 = vsub.s32 %v89_v32, %v91_v33 }
   0x6   :  { %182 = vmatpush1.msra.mxu1 %v74_v6  ;;  %474 = vmatprep.subr.mxu0 %v57_v7  ;;  %v72_v12 = vld [vmem:[%s952_s1 + $0x160] sm:$0xff]  ;;  %v71_v15 = vld [vmem:[%s952_s1 + $0x158] sm:$0xff]  ;;  %v70_v18 = vld [vmem:[%s952_s1 + $0x150] sm:$0xff] }
   0x7   :  { %183 = vmatprep.subr.mxu1 %v618_v3  ;;  %475 = vmatpush3.msra.mxu0 %v41_v8  ;;  %v53_v19 = vld [vmem:[%s952_s1 + $0xc8] sm:$0xff]  ;;  %v52_v22 = vld [vmem:[%s952_s1 + $0xc0] sm:$0xff]  ;;  %v51_v28 = vld [vmem:[%s952_s1 + $0xb8] sm:$0xff] }
   0x8   :  { %184 = vmatpush1.msra.mxu1 %v73_v9  ;;  %476 = vmatprep.subr.mxu0 %v56_v10  ;;  %v37_v20 = vld [vmem:[%s952_s1 + $0x48] sm:$0xff]  ;;  %v36_v26 = vld [vmem:[%s952_s1 + $0x40] sm:$0xff]  ;;  %v35_v29 = vld [vmem:[%s952_s1 + $0x38] sm:$0xff] }
   0x9   :  { %185 = vmatprep.subr.mxu1 %v618_v3  ;;  %477 = vmatpush3.msra.mxu0 %v40_v11  ;;  %v69_v21 = vld [vmem:[%s952_s1 + $0x148] sm:$0xff]  ;;  %v68_v27 = vld [vmem:[%s952_s1 + $0x140] sm:$0xff]  ;;  %v67_v30 = vld [vmem:[%s952_s1 + $0x138] sm:$0xff] }
   0xa   :  { %186 = vmatpush1.msra.mxu1 %v72_v12  ;;  %478 = vmatprep.subr.mxu0 %v55_v13  ;;  %v50_v31 = vld [vmem:[%s952_s1 + $0xb0] sm:$0xff]  ;;  %v49_v36 = vld [vmem:[%s952_s1 + $0xa8] sm:$0xff]  ;;  %v48_v39 = vld [vmem:[%s952_s1 + $0xa0] sm:$0xff] }
   0xb   :  { %187 = vmatprep.subr.mxu1 %v618_v3  ;;  %479 = vmatpush3.msra.mxu0 %v39_v14  ;;  %v34_v34 = vld [vmem:[%s952_s1 + $0x30] sm:$0xff]  ;;  %v33_v37 = vld [vmem:[%s952_s1 + $0x28] sm:$0xff] }
   0xc   :  { %188 = vmatpush1.msra.mxu1 %v71_v15  ;;  %480 = vmatprep.subr.mxu0 %v54_v16  ;;  %v66_v35 = vld [vmem:[%s952_s1 + $0x130] sm:$0xff]  ;;  %v65_v38 = vld [vmem:[%s952_s1 + $0x128] sm:$0xff] }
   0xd   :  { %189 = vmatprep.subr.mxu1 %v618_v3  ;;  %481 = vmatpush3.msra.mxu0 %v38_v17 }
   0xe   :  { %190 = vmatpush1.msra.mxu1 %v70_v18  ;;  %482 = vmatprep.subr.mxu0 %v53_v19 }
   0xf   :  { %191 = vmatprep.subr.mxu1 %v618_v3  ;;  %483 = vmatpush3.msra.mxu0 %v37_v20 }
  0x10   :  { %192 = vmatpush1.msra.mxu1 %v69_v21  ;;  %484 = vmatprep.subr.mxu0 %v52_v22 }
  0x11   :  { %193 = vmatprep.subr.mxu1 %v618_v3  ;;  %485 = vmatpush3.msra.mxu0 %v36_v26 }
  0x12   :  { %194 = vmatpush1.msra.mxu1 %v68_v27  ;;  %486 = vmatprep.subr.mxu0 %v51_v28 }
  0x13   :  { %195 = vmatprep.subr.mxu1 %v618_v3  ;;  %487 = vmatpush3.msra.mxu0 %v35_v29 }
  0x14   :  { %196 = vmatpush1.msra.mxu1 %v67_v30  ;;  %488 = vmatprep.subr.mxu0 %v50_v31 }
  0x15   :  { %197 = vmatprep.subr.mxu1 %v618_v3  ;;  %489 = vmatpush3.msra.mxu0 %v34_v34 }
  0x16   :  { %198 = vmatpush1.msra.mxu1 %v66_v35 }
  0x17   :  { %12 = vsyncpa [#allocation3], 0  ;;  %490 = vmatprep.subr.mxu0 %v49_v36  ;;  %199 = vmatprep.subr.mxu1 %v618_v3  ;;  %v32_v41 = vld [vmem:[%s952_s1 + $0x20] sm:$0xff]  ;;  %v47_v44 = vld [vmem:[%s952_s1 + $0x98] sm:$0xff]  ;;  %vm106_vm0 = vcmask 130048   ;;  %vm620_vm1 = vmmov 0  }
  0x18   :  { %v64_v42 = vld [vmem:[%s952_s1 + $0x120] sm:$0xff]  ;;  %491 = vmatpush3.msra.mxu0 %v33_v37  ;;  %200 = vmatpush1.msra.mxu1 %v65_v38  ;;  %v31_v46 = vld [vmem:[%s952_s1 + $0x18] sm:$0xff]  ;;  %v46_v48 = vld [vmem:[%s952_s1 + $0x90] sm:$0xff]  ;;  %vm373_vm2 = vcmask 1043456   ;;  %vm274_vm4 = vcmask 982016   ;;  %vm369_vm6 = vcmask 687104  }
  0x19   :  { %v27_v43 = vld [vmem:[%s951_s0] sm:$0xff]  ;;  %492 = vmatprep.subr.mxu0 %v48_v39  ;;  %201 = vmatprep.subr.mxu1 %v618_v3  ;;  %v63_v47 = vld [vmem:[%s952_s1 + $0x118] sm:$0xff]  ;;  %v30_v50 = vld [vmem:[%s952_s1 + $0x10] sm:$0xff]  ;;  %vm447_vm7 = vcmask 74752  }
  0x1a   :  { %v86_v45 = vcombine.high %v27_v43, %v27_v43  ;;  %493 = vmatpush3.msra.mxu0 %v32_v41  ;;  %202 = vmatpush1.msra.mxu1 %v64_v42  ;;  %v93_v49 = vrot.slane %v27_v43, %v92_v40  ;;  %v62_v51 = vld [vmem:[%s952_s1 + $0x110] sm:$0xff]  ;;  %v45_v52 = vld [vmem:[%s952_s1 + $0x88] sm:$0xff]  ;;  %v44_v56 = vld [vmem:[%s952_s1 + $0x80] sm:$0xff] }
  0x1b   :  { %494 = vmatprep.subr.mxu0 %v47_v44  ;;  %203 = vmatprep.subr.mxu1 %v618_v3  ;;  %v29_v54 = vld [vmem:[%s952_s1 + $0x8] sm:$0xff]  ;;  %v28_v58 = vld [vmem:[%s952_s1] sm:$0xff]  ;;  %v266_v62 = vld [vmem:[%s954_s3 + $0x70] sm:$0xff] }
  0x1c   :  { %495 = vmatpush3.msra.mxu0 %v31_v46  ;;  %204 = vmatpush1.msra.mxu1 %v63_v47  ;;  %v100_v53 = vrot.slane %v86_v45, %v92_v40  ;;  %v61_v55 = vld [vmem:[%s952_s1 + $0x108] sm:$0xff]  ;;  %v101_v57 = vcombine.high %v93_v49, %v93_v49  ;;  %v60_v59 = vld [vmem:[%s952_s1 + $0x100] sm:$0xff]  ;;  %v263_v2 = vld [vmem:[%s954_s3 + $0x58] sm:$0xff] }
  0x1d   :  { %496 = vmatprep.subr.mxu0 %v46_v48  ;;  %205 = vmatprep.subr.mxu1 %v618_v3  ;;  %v77_v61 = vld [vmem:[%s952_s1 + $0x188] sm:$0xff]  ;;  %v76_v63 = vld [vmem:[%s952_s1 + $0x180] sm:$0xff]  ;;  %v262_v4 = vld [vmem:[%s954_s3 + $0x50] sm:$0xff]  ;;  %s621_s1 = smov [#allocation2]  }
  0x1e   :  { %497 = vmatpush3.msra.mxu0 %v30_v50  ;;  %206 = vmatpush1.msra.mxu1 %v62_v51  ;;  %v102_v60 = vcombine.high %v100_v53, %v100_v53  ;;  %v265_v0 = vld [vmem:[%s954_s3 + $0x68] sm:$0xff]  ;;  %v264_v1 = vld [vmem:[%s954_s3 + $0x60] sm:$0xff]  ;;  %v259_v7 = vld [vmem:[%s954_s3 + $0x38] sm:$0xff]  ;;  %s455_s15 = sshll.u32 %s621_s1, 4  ;;  %s456_s15 = int_to_ptr.vmem [resolvable:$true] %s455_s15 }
  0x1f   :  { %498 = vmatprep.subr.mxu0 %v45_v52  ;;  %207 = vmatprep.subr.mxu1 %v618_v3  ;;  %v261_v5 = vld [vmem:[%s954_s3 + $0x48] sm:$0xff]  ;;  %v260_v6 = vld [vmem:[%s954_s3 + $0x40] sm:$0xff]  ;;  %v258_v8 = vld [vmem:[%s954_s3 + $0x30] sm:$0xff]  ;;  %p601_p1 = scmp.lt.s32.totalorder %s456_s15, %s456_s15 }
  0x20   :  { %499 = vmatpush3.msra.mxu0 %v29_v54  ;;  %208 = vmatpush1.msra.mxu1 %v61_v55  ;;  %v257_v9 = vld [vmem:[%s954_s3 + $0x28] sm:$0xff]  ;;  %v256_v10 = vld [vmem:[%s954_s3 + $0x20] sm:$0xff]  ;;  %v255_v11 = vld [vmem:[%s954_s3 + $0x18] sm:$0xff] }
  0x21   :  { %500 = vmatprep.subr.mxu0 %v44_v56  ;;  %209 = vmatprep.subr.mxu1 %v618_v3  ;;  %v254_v12 = vld [vmem:[%s954_s3 + $0x10] sm:$0xff]  ;;  %v253_v13 = vld [vmem:[%s954_s3 + $0x8] sm:$0xff]  ;;  %v252_v14 = vld [vmem:[%s954_s3] sm:$0xff] }
  0x22   :  { %501 = vmatpush3.msra.mxu0 %v28_v58  ;;  %173 = vmatprep.mubr.f32.mxu0 %v101_v57  ;;  %v361_v15 = vld [vmem:[%s956_s5 + $0x50] sm:$0xf]  ;;  %v360_v16 = vld [vmem:[%s956_s5 + $0x48] sm:$0xff]  ;;  %v359_v17 = vld [vmem:[%s956_s5 + $0x40] sm:$0xff] }
  0x23   :  { %210 = vmatpush1.msra.mxu1 %v60_v59  ;;  %174 = vmatmul.mubr.f32.vlgmr.msra.gmra.mxu0 %v93_v49  ;;  %v358_v18 = vld [vmem:[%s956_s5 + $0x38] sm:$0xff]  ;;  %v357_v19 = vld [vmem:[%s956_s5 + $0x30] sm:$0xff]  ;;  %v356_v20 = vld [vmem:[%s956_s5 + $0x28] sm:$0xff] }
  0x24   :  { %239 = vmatprep.subr.mxu1 %v618_v3  ;;  %464 = vmatprep.mubr.msk.f32.mxu1 %vm106_vm0, %v102_v60  ;;  %v355_v21 = vld [vmem:[%s956_s5 + $0x20] sm:$0xff]  ;;  %v354_v22 = vld [vmem:[%s956_s5 + $0x18] sm:$0xff]  ;;  %v353_v33 = vld [vmem:[%s956_s5 + $0x10] sm:$0xff] }
  0x25   :  { %240 = vmatpush2.msra.mxu1 %v77_v61  ;;  %533 = vmatprep.subr.mxu0 %v618_v3  ;;  %v463_v25 = vld [vmem:[%s953_s2] ss:$0 sm:$0xff]  ;;  %v352_v34 = vld [vmem:[%s956_s5 + $0x8] sm:$0xff] }
  0x26   :  { %241 = vmatprep.subr.mxu1 %v618_v3  ;;  %534 = vmatpush3.msra.mxu0 %v266_v62  ;;  %v351_v35 = vld [vmem:[%s956_s5] sm:$0xff] }
  0x27   :  { %242 = vmatpush2.msra.mxu1 %v76_v63  ;;  %535 = vmatprep.subr.mxu0 %v618_v3  ;;  %v465_v36 = vld [vmem:[%s955_s4] ss:$0 sm:$0xff]  ;;  %s596_s4 = scalar_lea.vmem %s456_s15, 32 }
  0x28   :  { %244 = vmatmul.mubr.f32.vlgmr.msra.gmra.mxu1 %v100_v53  ;;  %536 = vmatpush3.msra.mxu0 %v265_v0  ;;  %p597_p0 = scmp.ne.s32.totalorder %s456_s15, %s596_s4  ;;  %p602_p2 = scmp.lt.s32.totalorder %s596_s4, %s596_s4 }
  0x29   :  { %537 = vmatprep.subr.mxu0 %v618_v3  ;;  %566 = vmatprep.subr.mxu1 %v618_v3 }
  0x2a   :  { %538 = vmatpush3.msra.mxu0 %v264_v1  ;;  %563 = vmatprep.mubr.msk.f32.mxu0 %vm620_vm1, %v618_v3  ;;  %p603_p3 = por %p602_p2, %p601_p1 }
  0x2b   :  { %539 = vmatprep.subr.mxu0 %v618_v3  ;;  %567 = vmatpush3.msk.msra.mxu1 %vm373_vm2, %v361_v15 }
  0x2c   :  { %540 = vmatpush3.msra.mxu0 %v263_v2  ;;  %588 = vmatprep.mubr.msk.f32.mxu1 %vm620_vm1, %v618_v3  ;;  %p604_p4 = pnand %p603_p3, %p597_p0 }
  0x2d   :  { %541 = vmatprep.subr.mxu0 %v618_v3  ;;  %568 = vmatprep.subr.mxu1 %v618_v3 }
  0x2e   :  { %542 = vmatpush3.msra.mxu0 %v262_v4  ;;  %569 = vmatpush3.msra.mxu1 %v360_v16 }
  0x2f   :  { %543 = vmatprep.subr.mxu0 %v618_v3  ;;  %570 = vmatprep.subr.mxu1 %v618_v3 }
  0x30   :  { %544 = vmatpush3.msra.mxu0 %v261_v5  ;;  %571 = vmatpush3.msra.mxu1 %v359_v17 }
  0x31   :  { %545 = vmatprep.subr.mxu0 %v618_v3  ;;  %572 = vmatprep.subr.mxu1 %v618_v3 }
  0x32   :  { %546 = vmatpush3.msra.mxu0 %v260_v6  ;;  %573 = vmatpush3.msra.mxu1 %v358_v18 }
  0x33   :  { %547 = vmatprep.subr.mxu0 %v618_v3  ;;  %574 = vmatprep.subr.mxu1 %v618_v3 }
  0x34   :  { %548 = vmatpush3.msra.mxu0 %v259_v7  ;;  %575 = vmatpush3.msra.mxu1 %v357_v19 }
  0x35   :  { %549 = vmatprep.subr.mxu0 %v618_v3  ;;  %576 = vmatprep.subr.mxu1 %v618_v3 }
  0x36   :  { %550 = vmatpush3.msra.mxu0 %v258_v8  ;;  %577 = vmatpush3.msra.mxu1 %v356_v20 }
  0x37   :  { %551 = vmatprep.subr.mxu0 %v618_v3  ;;  %578 = vmatprep.subr.mxu1 %v618_v3 }
  0x38   :  { %552 = vmatpush3.msra.mxu0 %v257_v9  ;;  %579 = vmatpush3.msra.mxu1 %v355_v21 }
  0x39   :  { %553 = vmatprep.subr.mxu0 %v618_v3  ;;  %580 = vmatprep.subr.mxu1 %v618_v3 }
  0x3a   :  { %554 = vmatpush3.msra.mxu0 %v256_v10  ;;  %581 = vmatpush3.msra.mxu1 %v354_v22 }
  0x3b   :  { %555 = vmatprep.subr.mxu0 %v618_v3  ;;  %582 = vmatprep.subr.mxu1 %v618_v3 }
  0x3c   :  { %556 = vmatpush3.msra.mxu0 %v255_v11  ;;  %583 = vmatpush3.msra.mxu1 %v353_v33 }
  0x3d   :  { %557 = vmatprep.subr.mxu0 %v618_v3  ;;  %584 = vmatprep.subr.mxu1 %v618_v3 }
  0x3e   :  { %558 = vmatpush3.msra.mxu0 %v254_v12  ;;  %585 = vmatpush3.msra.mxu1 %v352_v34 }
  0x3f   :  { %559 = vmatprep.subr.mxu0 %v618_v3  ;;  %586 = vmatprep.subr.mxu1 %v618_v3 }
  0x40   :  { %560 = vmatpush3.msra.mxu0 %v253_v13  ;;  %587 = vmatpush3.msra.mxu1 %v351_v35 }
  0x41   :  { %561 = vmatprep.subr.mxu0 %v618_v3  ;;  %v467_v3 = vld [vmem:[%s957_s6] ss:$0 sm:$0xff] }
  0x42   :  { %562 = vmatpush3.msra.mxu0 %v252_v14 }
  0xe3   :  { %v502_v23 = vpop.f32.mrf.mxu0 }
  0xe5   :  { %v503_v24 = vpop.f32.mrf.mxu0 }
  0xe6   :  { %v504_v26 = vadd.f32 %v503_v24, %v502_v23 }
  0xe8   :  { %v176_v27 = vadd.f32 %v504_v26, %v463_v25  ;;  %v245_v28 = vpop.f32.mrf.mxu1 }
  0xea   :  { %v246_v29 = vadd.f32 %v245_v28, %v176_v27  ;;  %v247_v30 = vpop.f32.mrf.mxu1 }
  0xec   :  { %vm249_vm3 = vcmp.gt.f32.partialorder %v246_v29, 0.0  ;;  %v250_v31 = vmul.f32 0.01, %v246_v29 }
  0xee   :  { %v251_v32 = vsel %vm249_vm3, %v246_v29, %v250_v31 }
  0xef   :  { %564 = vmatmul.mubr.msk.f32.vlgmr.msra.gmra.mxu0 %vm274_vm4, %v251_v32 }
 0x1af   :  { %v344_v37 = vpop.f32.mrf.mxu0 }
 0x1b0   :  { %v345_v38 = vadd.f32 %v465_v36, %v344_v37 }
 0x1b1   :  { %v565_v39 = vpop.f32.mrf.mxu0 }
 0x1b2   :  { %vm348_vm5 = vcmp.gt.f32.partialorder %v345_v38, 0.0  ;;  %v349_v40 = vmul.f32 0.01, %v345_v38 }
 0x1b4   :  { %v350_v41 = vsel %vm348_vm5, %v345_v38, %v349_v40 }
 0x1b5   :  { %589 = vmatmul.mubr.msk.f32.vlgmr.msra.gmra.mxu1 %vm369_vm6, %v350_v41 }
 0x275   :  { %v443_v42 = vpop.f32.mrf.mxu1 }
 0x276   :  { %v444_v43 = vadd.f32 %v467_v3, %v443_v42 }
 0x277   :  { %v590_v44 = vpop.f32.mrf.mxu1 }
 0x278   :  { %448 = vst.msk [vmem:[#allocation2] sm:$0x3] %vm447_vm7, %v444_v43 }
 0x279   :  { %607 = shalt.err (!%p604_p4)
}
 0x27a   :  { %458 = dma.vmem_to_hbm [thread:$0]  %s456_s15, 32, %s958_s7, [#allocation3]  }
 0x27b   :  { %616 = dma.done.wait [#allocation3], 32  }
 0x27c   :  { %617 = vsyncadd [#allocation3], 4294967264 }
 0x27d   :  { %462 = vsyncpa [#allocation3], 1 }

// kernel: net_forward.4
= control target key start
LH: loop header
LB: loop body
LE: loop exit
PB: predicated region body
PF: predicated region fallthrough
CT: control target
= control target key end

     0   :  { %s1577_s18 = smov 0   ;;  %s2359_s0 = inlined_call_operand.vmem [shape: f32[2,14,84], index: 0, kind: input, shape index: {}]   ;;  %s2360_s1 = inlined_call_operand.vmem [shape: f32[5,84,160], index: 1, kind: input, shape index: {}]   ;;  %s2361_s2 = inlined_call_operand.vmem [shape: f32[1,160], index: 2, kind: input, shape index: {}]   ;;  %s2362_s3 = inlined_call_operand.vmem [shape: f32[2,5,10], index: 3, kind: input, shape index: {}]   ;;  %s2363_s4 = inlined_call_operand.vmem [shape: f32[2,160,80], index: 4, kind: input, shape index: {}]   ;;  %s2364_s5 = inlined_call_operand.vmem [shape: f32[2,5,80], index: 5, kind: output, shape index: {}]  }
   0x1 LB: > { %s1379_s19 = sadd.s32 4294967295, %s1544_s18   ;;  %p1383_p0 = scmp.ge.s32.totalorder %s1544_s18, 1  ;;  %s1544_s18 = sphi %s1577_s18, %s15_s18  }
   0x2   : > { %p187_p1 = scmp.lt.s32.totalorder %s1544_s18, 3 }
   0x4   : > { %p188_p2 = pnand %p1383_p0, %p187_p1 }
   0x5   : > { %p1651_p3 = scmp.lt.s32.totalorder (!%p188_p2), %s1379_s19, 1 }
   0x6   : > { %191 = sbr.rel (%p188_p2) target bundleno = 728 (0x2d8), region = 40 }
   0xb   : > { %v1408_v0 = vld [vmem:[%s2360_s1 + $0x158] sm:$0xf]  ;;  %vm279_vm0 = vcmask 1043456   ;;  %v246_v1 = vld [vmem:[%s2360_s1 + $0xa8] sm:$0xf]  ;;  %v1405_v6 = vld [vmem:[%s2360_s1 + $0x140] sm:$0xff] }
   0xc   : > { %v1406_v2 = vld [vmem:[%s2360_s1 + $0x148] sm:$0xff]  ;;  %1409 = vmatprep.subr.msk.mxu0 %vm279_vm0, %v1408_v0  ;;  %1413 = vmatprep.subr.msk.mxu1 %vm279_vm0, %v246_v1  ;;  %v1407_v3 = vld [vmem:[%s2360_s1 + $0x150] sm:$0xf]  ;;  %v245_v4 = vld [vmem:[%s2360_s1 + $0xa0] sm:$0xf]  ;;  %s2367_s19 = smov (!%p1651_p3, %s1379_s19), 1 }
   0xd   : > { %v244_v5 = vld [vmem:[%s2360_s1 + $0x98] sm:$0xff]  ;;  %1410 = vmatpush1.msk.msra.mxu0 %vm279_vm0, %v1407_v3  ;;  %1414 = vmatpush1.msk.msra.mxu1 %vm279_vm0, %v245_v4  ;;  %v243_v7 = vld [vmem:[%s2360_s1 + $0x90] sm:$0xff]  ;;  %v242_v9 = vld [vmem:[%s2360_s1 + $0x88] sm:$0xff]  ;;  %s1528_s24 = sshll.u32 %s2367_s19, 4  ;;  %vm272_vm1 = vcmask 687104   ;;  %v1546_v46 = vmov 0.0  }
   0xe   : > { %v1404_v8 = vld [vmem:[%s2360_s1 + $0x138] sm:$0xff]  ;;  %298 = vmatprep.subr.mxu0 %v1406_v2  ;;  %387 = vmatprep.subr.mxu1 %v244_v5  ;;  %v1403_v10 = vld [vmem:[%s2360_s1 + $0x130] sm:$0xff]  ;;  %v241_v11 = vld [vmem:[%s2360_s1 + $0x80] sm:$0xff]  ;;  %s1731_s14 = scalar_lea.vmem %s2359_s0, %s1528_s24  ;;  %vm839_vm2 = vcmask 1041408   ;;  %vm835_vm7 = vcmask 80896   ;;  %vm1013_vm8 = vcmask 261120  }
   0xf   : > { %299 = vmatpush1.msra.mxu0 %v1405_v6  ;;  %388 = vmatpush1.msra.mxu1 %v243_v7  ;;  %v1402_v12 = vld [vmem:[%s2360_s1 + $0x128] sm:$0xff]  ;;  %v240_v13 = vld [vmem:[%s2360_s1 + $0x78] sm:$0xff]  ;;  %v1401_v14 = vld [vmem:[%s2360_s1 + $0x120] sm:$0xff]  ;;  %s1386_s12 = sshll.u32 %s2367_s19, 3  ;;  %vm1324_vm9 = vcmask 651264  }
  0x10   : > { %300 = vmatprep.subr.mxu0 %v1404_v8  ;;  %389 = vmatprep.subr.mxu1 %v242_v9  ;;  %v239_v15 = vld [vmem:[%s2360_s1 + $0x70] sm:$0xff]  ;;  %v1400_v16 = vld [vmem:[%s2360_s1 + $0x118] sm:$0xff]  ;;  %v238_v17 = vld [vmem:[%s2360_s1 + $0x68] sm:$0xff]  ;;  %s222_s16 = scalar_lea.vmem %s2364_s5, %s1386_s12 }
  0x11   : > { %301 = vmatpush1.msra.mxu0 %v1403_v10  ;;  %390 = vmatpush1.msra.mxu1 %v241_v11  ;;  %v1399_v18 = vld [vmem:[%s2360_s1 + $0x110] sm:$0xff]  ;;  %v237_v19 = vld [vmem:[%s2360_s1 + $0x60] sm:$0xff]  ;;  %v1398_v20 = vld [vmem:[%s2360_s1 + $0x108] sm:$0xff] }
  0x12   : > { %302 = vmatprep.subr.mxu0 %v1402_v12  ;;  %391 = vmatprep.subr.mxu1 %v240_v13  ;;  %v236_v21 = vld [vmem:[%s2360_s1 + $0x58] sm:$0xff]  ;;  %v1397_v22 = vld [vmem:[%s2360_s1 + $0x100] sm:$0xff]  ;;  %v235_v23 = vld [vmem:[%s2360_s1 + $0x50] sm:$0xff] }
  0x13   : > { %303 = vmatpush1.msra.mxu0 %v1401_v14  ;;  %392 = vmatpush1.msra.mxu1 %v239_v15  ;;  %v1396_v24 = vld [vmem:[%s2360_s1 + $0xf8] sm:$0xff]  ;;  %v234_v25 = vld [vmem:[%s2360_s1 + $0x48] sm:$0xff]  ;;  %v1395_v26 = vld [vmem:[%s2360_s1 + $0xf0] sm:$0xff] }
  0x14   : > { %304 = vmatprep.subr.mxu0 %v1400_v16  ;;  %393 = vmatprep.subr.mxu1 %v238_v17  ;;  %v233_v27 = vld [vmem:[%s2360_s1 + $0x40] sm:$0xff]  ;;  %v1394_v28 = vld [vmem:[%s2360_s1 + $0xe8] sm:$0xff]  ;;  %v232_v29 = vld [vmem:[%s2360_s1 + $0x38] sm:$0xff] }
  0x15   : > { %305 = vmatpush1.msra.mxu0 %v1399_v18  ;;  %394 = vmatpush1.msra.mxu1 %v237_v19  ;;  %v1393_v30 = vld [vmem:[%s2360_s1 + $0xe0] sm:$0xff]  ;;  %v231_v31 = vld [vmem:[%s2360_s1 + $0x30] sm:$0xff]  ;;  %v1392_v32 = vld [vmem:[%s2360_s1 + $0xd8] sm:$0xff] }
  0x16   : > { %306 = vmatprep.subr.mxu0 %v1398_v20  ;;  %395 = vmatprep.subr.mxu1 %v236_v21  ;;  %v230_v33 = vld [vmem:[%s2360_s1 + $0x28] sm:$0xff]  ;;  %v1391_v34 = vld [vmem:[%s2360_s1 + $0xd0] sm:$0xff]  ;;  %v229_v35 = vld [vmem:[%s2360_s1 + $0x20] sm:$0xff] }
  0x17   : > { %307 = vmatpush1.msra.mxu0 %v1397_v22  ;;  %396 = vmatpush1.msra.mxu1 %v235_v23  ;;  %v1390_v36 = vld [vmem:[%s2360_s1 + $0xc8] sm:$0xff]  ;;  %v228_v37 = vld [vmem:[%s2360_s1 + $0x18] sm:$0xff]  ;;  %v1389_v38 = vld [vmem:[%s2360_s1 + $0xc0] sm:$0xff] }
  0x18   : > { %308 = vmatprep.subr.mxu0 %v1396_v24  ;;  %397 = vmatprep.subr.mxu1 %v234_v25  ;;  %v227_v39 = vld [vmem:[%s2360_s1 + $0x10] sm:$0xff]  ;;  %v1388_v40 = vld [vmem:[%s2360_s1 + $0xb8] sm:$0xff]  ;;  %v226_v41 = vld [vmem:[%s2360_s1 + $0x8] sm:$0xff] }
  0x19   : > { %309 = vmatpush1.msra.mxu0 %v1395_v26  ;;  %398 = vmatpush1.msra.mxu1 %v233_v27  ;;  %v1387_v42 = vld [vmem:[%s2360_s1 + $0xb0] sm:$0xff]  ;;  %v225_v43 = vld [vmem:[%s2360_s1] sm:$0xff]  ;;  %v1438_v47 = vld [vmem:[%s2360_s1 + $0x208] sm:$0xf] }
  0x1a   : > { %310 = vmatprep.subr.mxu0 %v1394_v28  ;;  %399 = vmatprep.subr.mxu1 %v232_v29  ;;  %v247_v44 = vld [vmem:[%s1731_s14 + $0x1] sm:$0xff]  ;;  %v1464_v48 = vld [vmem:[%s2360_s1 + $0x2b8] sm:$0xf]  ;;  %v1463_v50 = vld [vmem:[%s2360_s1 + $0x2b0] sm:$0xf] }
  0x1b   : > { %311 = vmatpush1.msra.mxu0 %v1393_v30  ;;  %400 = vmatpush1.msra.mxu1 %v231_v31  ;;  %v223_v45 = vld [vmem:[%s1731_s14] sm:$0xff]  ;;  %v1436_v51 = vld [vmem:[%s2360_s1 + $0x1f8] sm:$0xff]  ;;  %v1462_v52 = vld [vmem:[%s2360_s1 + $0x2a8] sm:$0xff] }
  0x1c   : > { %312 = vmatprep.subr.mxu0 %v1392_v32  ;;  %401 = vmatprep.subr.mxu1 %v230_v33  ;;  %v1437_v49 = vld [vmem:[%s2360_s1 + $0x200] sm:$0xf]  ;;  %v1435_v53 = vld [vmem:[%s2360_s1 + $0x1f0] sm:$0xff]  ;;  %v1434_v55 = vld [vmem:[%s2360_s1 + $0x1e8] sm:$0xff] }
  0x1d   : > { %313 = vmatpush1.msra.mxu0 %v1391_v34  ;;  %402 = vmatpush1.msra.mxu1 %v229_v35  ;;  %v1461_v54 = vld [vmem:[%s2360_s1 + $0x2a0] sm:$0xff]  ;;  %v1460_v56 = vld [vmem:[%s2360_s1 + $0x298] sm:$0xff]  ;;  %v1459_v58 = vld [vmem:[%s2360_s1 + $0x290] sm:$0xff] }
  0x1e   : > { %314 = vmatprep.subr.mxu0 %v1390_v36  ;;  %403 = vmatprep.subr.mxu1 %v228_v37  ;;  %v1433_v57 = vld [vmem:[%s2360_s1 + $0x1e0] sm:$0xff]  ;;  %v1432_v59 = vld [vmem:[%s2360_s1 + $0x1d8] sm:$0xff]  ;;  %v1458_v60 = vld [vmem:[%s2360_s1 + $0x288] sm:$0xff] }
  0x1f   : > { %315 = vmatpush1.msra.mxu0 %v1389_v38  ;;  %404 = vmatpush1.msra.mxu1 %v227_v39  ;;  %v1431_v61 = vld [vmem:[%s2360_s1 + $0x1d0] sm:$0xff]  ;;  %v1457_v62 = vld [vmem:[%s2360_s1 + $0x280] sm:$0xff]  ;;  %v1430_v63 = vld [vmem:[%s2360_s1 + $0x1c8] sm:$0xff] }
  0x20   : > { %316 = vmatprep.subr.mxu0 %v1388_v40  ;;  %405 = vmatprep.subr.mxu1 %v226_v41  ;;  %v1456_v0 = vld [vmem:[%s2360_s1 + $0x278] sm:$0xff]  ;;  %v1429_v1 = vld [vmem:[%s2360_s1 + $0x1c0] sm:$0xff]  ;;  %v1455_v2 = vld [vmem:[%s2360_s1 + $0x270] sm:$0xff] }
  0x21   : > { %317 = vmatpush1.msra.mxu0 %v1387_v42  ;;  %350 = vmatprep.mubr.f32.mxu0 %v1546_v46  ;;  %v1428_v3 = vld [vmem:[%s2360_s1 + $0x1b8] sm:$0xff]  ;;  %v1454_v4 = vld [vmem:[%s2360_s1 + $0x268] sm:$0xff]  ;;  %v1427_v5 = vld [vmem:[%s2360_s1 + $0x1b0] sm:$0xff] }
  0x22   : > { %406 = vmatpush1.msra.mxu1 %v225_v43  ;;  %439 = vmatprep.mubr.f32.mxu1 %v1546_v46  ;;  %v1453_v6 = vld [vmem:[%s2360_s1 + $0x260] sm:$0xff]  ;;  %v1426_v7 = vld [vmem:[%s2360_s1 + $0x1a8] sm:$0xff]  ;;  %v1452_v8 = vld [vmem:[%s2360_s1 + $0x258] sm:$0xff] }
  0x23   : > { %1411 = vmatmul.mubr.msk.f32.vlgmr.msra.gmra.mxu0 %vm272_vm1, %v247_v44  ;;  %1415 = vmatmul.mubr.msk.f32.vlgmr.msra.gmra.mxu1 %vm272_vm1, %v223_v45  ;;  %v1425_v9 = vld [vmem:[%s2360_s1 + $0x1a0] sm:$0xff]  ;;  %v1451_v10 = vld [vmem:[%s2360_s1 + $0x250] sm:$0xff]  ;;  %v1424_v11 = vld [vmem:[%s2360_s1 + $0x198] sm:$0xff] }
  0x24   : > { %1439 = vmatprep.subr.msk.mxu0 %vm279_vm0, %v1438_v47  ;;  %1465 = vmatprep.subr.msk.mxu1 %vm279_vm0, %v1464_v48  ;;  %v1423_v12 = vld [vmem:[%s2360_s1 + $0x190] sm:$0xff]  ;;  %v1422_v13 = vld [vmem:[%s2360_s1 + $0x188] sm:$0xff]  ;;  %v1421_v17 = vld [vmem:[%s2360_s1 + $0x180] sm:$0xff] }
  0x25   : > { %1440 = vmatpush1.msk.msra.mxu0 %vm279_vm0, %v1437_v49  ;;  %1466 = vmatpush1.msk.msra.mxu1 %vm279_vm0, %v1463_v50  ;;  %v1450_v14 = vld [vmem:[%s2360_s1 + $0x248] sm:$0xff]  ;;  %v1449_v18 = vld [vmem:[%s2360_s1 + $0x240] sm:$0xff]  ;;  %v1420_v19 = vld [vmem:[%s2360_s1 + $0x178] sm:$0xff] }
  0x26   : > { %501 = vmatprep.subr.mxu0 %v1436_v51  ;;  %619 = vmatprep.subr.mxu1 %v1462_v52  ;;  %v248_v15 = vld [vmem:[%s1731_s14 + $0x9] sm:$0x3]  ;;  %v1448_v20 = vld [vmem:[%s2360_s1 + $0x238] sm:$0xff]  ;;  %v1419_v21 = vld [vmem:[%s2360_s1 + $0x170] sm:$0xff] }
  0x27   : > { %502 = vmatpush1.msra.mxu0 %v1435_v53  ;;  %620 = vmatpush1.msra.mxu1 %v1461_v54  ;;  %v224_v16 = vld [vmem:[%s1731_s14 + $0x8] sm:$0x3]  ;;  %v1447_v22 = vld [vmem:[%s2360_s1 + $0x230] sm:$0xff]  ;;  %v1417_v25 = vld [vmem:[%s2360_s1 + $0x160] sm:$0xff] }
  0x28   : > { %503 = vmatprep.subr.mxu0 %v1434_v55  ;;  %621 = vmatprep.subr.mxu1 %v1460_v56  ;;  %v1418_v23 = vld [vmem:[%s2360_s1 + $0x168] sm:$0xff]  ;;  %v1445_v26 = vld [vmem:[%s2360_s1 + $0x220] sm:$0xff]  ;;  %v1444_v28 = vld [vmem:[%s2360_s1 + $0x218] sm:$0xff] }
  0x29   : > { %504 = vmatpush1.msra.mxu0 %v1433_v57  ;;  %622 = vmatpush1.msra.mxu1 %v1459_v58  ;;  %v1446_v24 = vld [vmem:[%s2360_s1 + $0x228] sm:$0xff]  ;;  %v1443_v30 = vld [vmem:[%s2360_s1 + $0x210] sm:$0xff]  ;;  %v1489_v31 = vld [vmem:[%s2360_s1 + $0x360] sm:$0xf] }
  0x2a   : > { %505 = vmatprep.subr.mxu0 %v1432_v59  ;;  %623 = vmatprep.subr.mxu1 %v1458_v60  ;;  %v452_v27 = vld [vmem:[%s1731_s14 + $0x2] sm:$0xff]  ;;  %v1488_v33 = vld [vmem:[%s2360_s1 + $0x358] sm:$0xff]  ;;  %v1487_v34 = vld [vmem:[%s2360_s1 + $0x350] sm:$0xff] }
  0x2b   : > { %506 = vmatpush1.msra.mxu0 %v1431_v61  ;;  %624 = vmatpush1.msra.mxu1 %v1457_v62  ;;  %v1490_v29 = vld [vmem:[%s2360_s1 + $0x368] sm:$0xf]  ;;  %v1485_v37 = vld [vmem:[%s2360_s1 + $0x340] sm:$0xff]  ;;  %v1484_v39 = vld [vmem:[%s2360_s1 + $0x338] sm:$0xff] }
  0x2c   : > { %507 = vmatprep.subr.mxu0 %v1430_v63  ;;  %625 = vmatprep.subr.mxu1 %v1456_v0  ;;  %v570_v32 = vld [vmem:[%s1731_s14 + $0x3] sm:$0xff]  ;;  %v571_v38 = vld [vmem:[%s1731_s14 + $0xb] sm:$0x3]  ;;  %v1483_v40 = vld [vmem:[%s2360_s1 + $0x330] sm:$0xff] }
  0x2d   : > { %508 = vmatpush1.msra.mxu0 %v1429_v1  ;;  %626 = vmatpush1.msra.mxu1 %v1455_v2  ;;  %v453_v35 = vld [vmem:[%s1731_s14 + $0xa] sm:$0x3]  ;;  %v1481_v42 = vld [vmem:[%s2360_s1 + $0x320] sm:$0xff]  ;;  %v1480_v43 = vld [vmem:[%s2360_s1 + $0x318] sm:$0xff] }
  0x2e   : > { %509 = vmatprep.subr.mxu0 %v1428_v3  ;;  %627 = vmatprep.subr.mxu1 %v1454_v4  ;;  %v1486_v36 = vld [vmem:[%s2360_s1 + $0x348] sm:$0xff]  ;;  %v1479_v44 = vld [vmem:[%s2360_s1 + $0x310] sm:$0xff]  ;;  %v1477_v47 = vld [vmem:[%s2360_s1 + $0x300] sm:$0xff] }
  0x2f   : > { %510 = vmatpush1.msra.mxu0 %v1427_v5  ;;  %628 = vmatpush1.msra.mxu1 %v1453_v6  ;;  %v1482_v41 = vld [vmem:[%s2360_s1 + $0x328] sm:$0xff]  ;;  %v1476_v48 = vld [vmem:[%s2360_s1 + $0x2f8] sm:$0xff]  ;;  %v1475_v49 = vld [vmem:[%s2360_s1 + $0x2f0] sm:$0xff] }
  0x30   : > { %511 = vmatprep.subr.mxu0 %v1426_v7  ;;  %629 = vmatprep.subr.mxu1 %v1452_v8  ;;  %v1478_v45 = vld [vmem:[%s2360_s1 + $0x308] sm:$0xff]  ;;  %v1473_v51 = vld [vmem:[%s2360_s1 + $0x2e0] sm:$0xff]  ;;  %v1472_v52 = vld [vmem:[%s2360_s1 + $0x2d8] sm:$0xff] }
  0x31   : > { %512 = vmatpush1.msra.mxu0 %v1425_v9  ;;  %630 = vmatpush1.msra.mxu1 %v1451_v10  ;;  %v1474_v50 = vld [vmem:[%s2360_s1 + $0x2e8] sm:$0xff]  ;;  %v1471_v53 = vld [vmem:[%s2360_s1 + $0x2d0] sm:$0xff]  ;;  %v1469_v55 = vld [vmem:[%s2360_s1 + $0x2c0] sm:$0xff] }
  0x32   : > { %513 = vmatprep.subr.mxu0 %v1424_v11  ;;  %356 = vmatprep.mubr.f32.mxu0 %v1546_v46  ;;  %v1470_v54 = vld [vmem:[%s2360_s1 + $0x2c8] sm:$0xff]  ;;  %v1978_v58 = vld [vmem:[%s2363_s4 + $0x118] sm:$0xff]  ;;  %v1985_v59 = vld [vmem:[%s2363_s4 + $0x110] sm:$0xff] }
  0x33   : > { %514 = vmatpush1.msra.mxu0 %v1423_v12  ;;  %445 = vmatprep.mubr.f32.mxu1 %v1546_v46  ;;  %v688_v56 = vld [vmem:[%s1731_s14 + $0x4] sm:$0xff]  ;;  %v689_v57 = vld [vmem:[%s1731_s14 + $0xc] sm:$0x3]  ;;  %v2006_v62 = vld [vmem:[%s2363_s4 + $0xf8] sm:$0xff] }
  0x34   : > { %515 = vmatprep.subr.mxu0 %v1422_v13  ;;  %631 = vmatprep.subr.mxu1 %v1450_v14  ;;  %v1992_v60 = vld [vmem:[%s2363_s4 + $0x108] sm:$0xff]  ;;  %v1999_v61 = vld [vmem:[%s2363_s4 + $0x100] sm:$0xff]  ;;  %v2013_v63 = vld [vmem:[%s2363_s4 + $0xf0] sm:$0xff] }
  0x35   : > { %1412 = vmatmul.mubr.msk.f32.gmra.mxu0 %vm272_vm1, %v248_v15  ;;  %1416 = vmatmul.mubr.msk.f32.gmra.mxu1 %vm272_vm1, %v224_v16  ;;  %v2020_v0 = vld [vmem:[%s2363_s4 + $0xe8] sm:$0xff]  ;;  %v2027_v1 = vld [vmem:[%s2363_s4 + $0xe0] sm:$0xff]  ;;  %v2034_v2 = vld [vmem:[%s2363_s4 + $0xd8] sm:$0xff] }
  0x36   : > { %516 = vmatpush1.msra.mxu0 %v1421_v17  ;;  %632 = vmatpush1.msra.mxu1 %v1449_v18  ;;  %v2041_v3 = vld [vmem:[%s2363_s4 + $0xd0] sm:$0xff]  ;;  %v2048_v4 = vld [vmem:[%s2363_s4 + $0xc8] sm:$0xff]  ;;  %v2055_v5 = vld [vmem:[%s2363_s4 + $0xc0] sm:$0xff] }
  0x37   : > { %517 = vmatprep.subr.mxu0 %v1420_v19  ;;  %633 = vmatprep.subr.mxu1 %v1448_v20  ;;  %v2062_v6 = vld [vmem:[%s2363_s4 + $0xb8] sm:$0xff]  ;;  %v2069_v7 = vld [vmem:[%s2363_s4 + $0xb0] sm:$0xff]  ;;  %v2076_v8 = vld [vmem:[%s2363_s4 + $0xa8] sm:$0xff] }
  0x38   : > { %518 = vmatpush1.msra.mxu0 %v1419_v21  ;;  %634 = vmatpush1.msra.mxu1 %v1447_v22  ;;  %v2083_v9 = vld [vmem:[%s2363_s4 + $0xa0] sm:$0xff]  ;;  %v2090_v10 = vld [vmem:[%s2363_s4 + $0x138] sm:$0xff]  ;;  %v2097_v11 = vld [vmem:[%s2363_s4 + $0x130] sm:$0xff] }
  0x39   : > { %519 = vmatprep.subr.mxu0 %v1418_v23  ;;  %635 = vmatprep.subr.mxu1 %v1446_v24  ;;  %v808_v23 = vlaneseq }
  0x3a   : > { %520 = vmatpush1.msra.mxu0 %v1417_v25  ;;  %553 = vmatprep.mubr.f32.mxu0 %v1546_v46 }
  0x3b   : > { %636 = vmatpush1.msra.mxu1 %v1445_v26  ;;  %1441 = vmatmul.mubr.msk.f32.vlgmr.msra.gmra.mxu0 %vm272_vm1, %v452_v27 }
  0x3c   : > { %637 = vmatprep.subr.mxu1 %v1444_v28  ;;  %1491 = vmatprep.subr.msk.mxu0 %vm279_vm0, %v1490_v29  ;;  %v809_v28 = vshrl.u32 %v808_v23, 7  ;;  %v1498_v23 = vld [vmem:[%s2362_s3 + $0x8] sm:$0x1f] }
  0x3d   : > { %638 = vmatpush1.msra.mxu1 %v1443_v30  ;;  %671 = vmatprep.mubr.f32.mxu1 %v1546_v46 }
  0x3e   : > { %1492 = vmatpush1.msk.msra.mxu0 %vm279_vm0, %v1489_v31  ;;  %1467 = vmatmul.mubr.msk.f32.vlgmr.msra.gmra.mxu1 %vm272_vm1, %v570_v32 }
  0x3f   : > { %737 = vmatprep.subr.mxu0 %v1488_v33  ;;  %559 = vmatprep.mubr.f32.mxu0 %v1546_v46 }
  0x40   : > { %738 = vmatpush1.msra.mxu0 %v1487_v34  ;;  %677 = vmatprep.mubr.f32.mxu1 %v1546_v46 }
  0x41   : > { %1442 = vmatmul.mubr.msk.f32.gmra.mxu0 %vm272_vm1, %v453_v35  ;;  %739 = vmatprep.subr.mxu0 %v1486_v36  ;;  %v814_v36 = vsub.s32 1, %v809_v28 }
  0x42   : > { %740 = vmatpush1.msra.mxu0 %v1485_v37  ;;  %1468 = vmatmul.mubr.msk.f32.gmra.mxu1 %vm272_vm1, %v571_v38  ;;  %v810_v38 = vsub.s32 0, %v809_v28  ;;  %v2145_v28 = vld [vmem:[%s2363_s4 + $0x58] sm:$0xff] }
  0x43   : > { %741 = vmatprep.subr.mxu0 %v1484_v39  ;;  %789 = vmatprep.mubr.f32.mxu0 %v1546_v46 }
  0x44   : > { %742 = vmatpush1.msra.mxu0 %v1483_v40  ;;  %910 = vmatprep.mubr.f32.mxu1 %v1546_v46 }
  0x45   : > { %743 = vmatprep.subr.mxu0 %v1482_v41  ;;  %v806_v41 = vld [vmem:[%s2361_s2] sm:$0x3] }
  0x46   : > { %744 = vmatpush1.msra.mxu0 %v1481_v42 }
  0x47   : > { %745 = vmatprep.subr.mxu0 %v1480_v43 }
  0x48   : > { %746 = vmatpush1.msra.mxu0 %v1479_v44 }
  0x49   : > { %747 = vmatprep.subr.mxu0 %v1478_v45 }
  0x4a   : > { %748 = vmatpush1.msra.mxu0 %v1477_v47 }
  0x4b   : > { %749 = vmatprep.subr.mxu0 %v1476_v48  ;;  %v815_v48 = vrot.slane %v806_v41, %v814_v36  ;;  %v2201_v36 = vld [vmem:[%s2363_s4 + $0x18] sm:$0xff] }
  0x4c   : > { %750 = vmatpush1.msra.mxu0 %v1475_v49 }
  0x4d   : > { %751 = vmatprep.subr.mxu0 %v1474_v50  ;;  %v811_v50 = vrot.slane %v806_v41, %v810_v38  ;;  %v2215_v38 = vld [vmem:[%s2363_s4 + $0x8] sm:$0xff]  ;;  %v2236_v41 = vld [vmem:[%s2363_s4 + $0x90] sm:$0xff] }
  0x4e   : > { %752 = vmatpush1.msra.mxu0 %v1473_v51 }
  0x4f   : > { %753 = vmatprep.subr.mxu0 %v1472_v52 }
  0x50   : > { %754 = vmatpush1.msra.mxu0 %v1471_v53 }
  0x51   : > { %755 = vmatprep.subr.mxu0 %v1470_v54 }
  0x52   : > { %756 = vmatpush1.msra.mxu0 %v1469_v55 }
  0x53   : > { %1493 = vmatmul.mubr.msk.f32.vlgmr.msra.gmra.mxu0 %vm272_vm1, %v688_v56  ;;  %1108 = vmatprep.subr.mxu0 %v1546_v46 }
  0x54   : > { %795 = vmatprep.mubr.f32.mxu0 %v1546_v46  ;;  %1109 = vmatpush1.msra.mxu0 %v1978_v58 }
  0x55   : > { %1110 = vmatprep.subr.mxu0 %v1546_v46 }
  0x56   : > { %1111 = vmatpush1.msra.mxu0 %v1985_v59 }
  0x57   : > { %1494 = vmatmul.mubr.msk.f32.gmra.mxu0 %vm272_vm1, %v689_v57  ;;  %1112 = vmatprep.subr.mxu0 %v1546_v46 }
  0x58   : > { %1113 = vmatpush1.msra.mxu0 %v1992_v60 }
  0x59   : > { %1114 = vmatprep.subr.mxu0 %v1546_v46 }
  0x5a   : > { %1115 = vmatpush1.msra.mxu0 %v1999_v61 }
  0x5b   : > { %1116 = vmatprep.subr.mxu0 %v1546_v46 }
  0x5c   : > { %1117 = vmatpush1.msra.mxu0 %v2006_v62 }
  0x5d   : > { %1118 = vmatprep.subr.mxu0 %v1546_v46 }
  0x5e   : > { %1119 = vmatpush1.msra.mxu0 %v2013_v63 }
  0x5f   : > { %1120 = vmatprep.subr.mxu0 %v1546_v46 }
  0x60   : > { %1121 = vmatpush1.msra.mxu0 %v2020_v0 }
  0x61   : > { %1122 = vmatprep.subr.mxu0 %v1546_v46 }
  0x62   : > { %1123 = vmatpush1.msra.mxu0 %v2027_v1 }
  0x63   : > { %1124 = vmatprep.subr.mxu0 %v1546_v46 }
  0x64   : > { %1125 = vmatpush1.msra.mxu0 %v2034_v2 }
  0x65   : > { %1126 = vmatprep.subr.mxu0 %v1546_v46 }
  0x66   : > { %1127 = vmatpush1.msra.mxu0 %v2041_v3 }
  0x67   : > { %1128 = vmatprep.subr.mxu0 %v1546_v46 }
  0x68   : > { %1129 = vmatpush1.msra.mxu0 %v2048_v4 }
  0x69   : > { %1130 = vmatprep.subr.mxu0 %v1546_v46 }
  0x6a   : > { %1131 = vmatpush1.msra.mxu0 %v2055_v5 }
  0x6b   : > { %1132 = vmatprep.subr.mxu0 %v1546_v46 }
  0x6c   : > { %1133 = vmatpush1.msra.mxu0 %v2062_v6 }
  0x6d   : > { %1134 = vmatprep.subr.mxu0 %v1546_v46 }
  0x6e   : > { %1135 = vmatpush1.msra.mxu0 %v2069_v7 }
  0x6f   : > { %1136 = vmatprep.subr.mxu0 %v1546_v46 }
  0x70   : > { %1137 = vmatpush1.msra.mxu0 %v2076_v8 }
  0x71   : > { %1138 = vmatprep.subr.mxu0 %v1546_v46 }
  0x72   : > { %1139 = vmatpush1.msra.mxu0 %v2083_v9 }
  0x73   : > { %1164 = vmatprep.subr.mxu0 %v1546_v46 }
  0x74   : > { %1165 = vmatpush2.msra.mxu0 %v2090_v10 }
  0x75   : > { %1166 = vmatprep.subr.mxu0 %v1546_v46 }
  0x76   : > { %1167 = vmatpush2.msra.mxu0 %v2097_v11 }
  0x77   : > { %1168 = vmatprep.subr.mxu0 %v1546_v46 }
  0xe3   : > { %v352_v12 = vpop.f32.mrf.mxu0  ;;  %v441_v14 = vpop.f32.mrf.mxu1 }
  0xe4   : > { %v442_v27 = vadd.f32 %v441_v14, %v352_v12 }
  0xe5   : > { %v354_v13 = vpop.f32.mrf.mxu0  ;;  %v443_v16 = vpop.f32.mrf.mxu1 }
  0xe6   : > { %v444_v26 = vadd.f32 %v443_v16, %v354_v13 }
  0xf5   : > { %v358_v15 = vpop.f32.mrf.mxu0  ;;  %v447_v18 = vpop.f32.mrf.mxu1 }
  0xf6   : > { %v448_v29 = vadd.f32 %v447_v18, %v358_v15 }
  0xf7   : > { %v360_v17 = vpop.f32.mrf.mxu0  ;;  %v449_v20 = vpop.f32.mrf.mxu1 }
  0xf8   : > { %v450_v34 = vadd.f32 %v449_v20, %v360_v17 }
  0xfb   : > { %v555_v19 = vpop.f32.mrf.mxu0 }
  0xfc   : > { %v566_v31 = vadd.f32 %v555_v19, %v442_v27  ;;  %v2138_v27 = vld [vmem:[%s2363_s4 + $0x60] sm:$0xff] }
  0xfd   : > { %v557_v21 = vpop.f32.mrf.mxu0 }
  0xfe   : > { %v673_v22 = vpop.f32.mrf.mxu1  ;;  %v567_v30 = vadd.f32 %v557_v21, %v444_v26  ;;  %v834_v21 = vld [vmem:[%s2362_s3] sm:$0x1f]  ;;  %v2131_v26 = vld [vmem:[%s2363_s4 + $0x68] sm:$0xff] }
  0xff   : > { %v684_v42 = vadd.f32 %v673_v22, %v566_v31  ;;  %v2166_v31 = vld [vmem:[%s2363_s4 + $0x40] sm:$0xff] }
 0x100   : > { %v675_v25 = vpop.f32.mrf.mxu1 }
 0x101   : > { %v561_v24 = vpop.f32.mrf.mxu0  ;;  %v685_v39 = vadd.f32 %v675_v25, %v567_v30  ;;  %v2124_v25 = vld [vmem:[%s2363_s4 + $0x70] sm:$0xff]  ;;  %v2159_v30 = vld [vmem:[%s2363_s4 + $0x48] sm:$0xff] }
 0x102   : > { %v679_v33 = vpop.f32.mrf.mxu1  ;;  %v568_v35 = vadd.f32 %v561_v24, %v448_v29  ;;  %v2118_v24 = vld [vmem:[%s2363_s4 + $0x78] sm:$0xff]  ;;  %v2152_v29 = vld [vmem:[%s2363_s4 + $0x50] sm:$0xff] }
 0x103   : > { %v563_v32 = vpop.f32.mrf.mxu0 }
 0x104   : > { %v569_v40 = vadd.f32 %v563_v32, %v450_v34  ;;  %v681_v43 = vpop.f32.mrf.mxu1  ;;  %v686_v45 = vadd.f32 %v679_v33, %v568_v35  ;;  %v2173_v32 = vld [vmem:[%s2363_s4 + $0x38] sm:$0xff]  ;;  %v2180_v33 = vld [vmem:[%s2363_s4 + $0x30] sm:$0xff]  ;;  %v2187_v34 = vld [vmem:[%s2363_s4 + $0x28] sm:$0xff] }
 0x105   : > { %v2194_v35 = vld [vmem:[%s2363_s4 + $0x20] sm:$0xff] }
 0x106   : > { %v687_v52 = vadd.f32 %v681_v43, %v569_v40  ;;  %v2229_v40 = vld [vmem:[%s2363_s4 + $0x98] sm:$0xff]  ;;  %v2250_v43 = vld [vmem:[%s2363_s4 + $0x128] sm:$0xff] }
 0x107   : > { %1169 = vmatpush2.msra.mxu0 %v2250_v43 }
 0x108   : > { %1170 = vmatprep.subr.mxu0 %v1546_v46 }
 0x113   : > { %v791_v37 = vpop.f32.mrf.mxu0 }
 0x114   : > { %v802_v49 = vadd.f32 %v791_v37, %v684_v42  ;;  %v2208_v37 = vld [vmem:[%s2363_s4 + $0x10] sm:$0xff]  ;;  %v2245_v42 = vld [vmem:[%s2363_s4 + $0x88] sm:$0xff] }
 0x115   : > { %v793_v44 = vpop.f32.mrf.mxu0 }
 0x116   : > { %v803_v47 = vadd.f32 %v793_v44, %v685_v39  ;;  %v818_v12 = vadd.f32 %v811_v50, %v802_v49  ;;  %v2222_v39 = vld [vmem:[%s2363_s4] sm:$0xff] }
 0x117   : > { %v797_v51 = vpop.f32.mrf.mxu0  ;;  %v2259_v44 = vld [vmem:[%s2363_s4 + $0x80] sm:$0xff] }
 0x118   : > { %v804_v53 = vadd.f32 %v797_v51, %v686_v45  ;;  %v819_v55 = vadd.f32 %v815_v48, %v803_v47  ;;  %v826_v17 = vmul.f32 0.01, %v818_v12  ;;  %vm822_vm6 = vcmp.gt.f32.partialorder %v818_v12, 0.0  ;;  %v2264_v45 = vld [vmem:[%s2363_s4 + $0x120] sm:$0xff] }
 0x119   : > { %v799_v54 = vpop.f32.mrf.mxu0  ;;  %1171 = vmatpush2.msra.mxu0 %v2264_v45 }
 0x11a   : > { %v820_v56 = vadd.f32 %v811_v50, %v804_v53  ;;  %v805_v57 = vadd.f32 %v799_v54, %v687_v52  ;;  %v827_v16 = vmul.f32 0.01, %v819_v55  ;;  %vm823_vm5 = vcmp.gt.f32.partialorder %v819_v55, 0.0  ;;  %1252 = vmatprep.subr.mxu0 %v1546_v46 }
 0x11b   : > { %v830_v22 = vsel %vm822_vm6, %v818_v12, %v826_v17 }
 0x11c   : > { %v821_v13 = vadd.f32 %v815_v48, %v805_v57  ;;  %v828_v14 = vmul.f32 0.01, %v820_v56  ;;  %vm824_vm3 = vcmp.gt.f32.partialorder %v820_v56, 0.0  ;;  %v831_v20 = vsel %vm823_vm5, %v819_v55, %v827_v16 }
 0x11e   : > { %v829_v15 = vmul.f32 0.01, %v821_v13  ;;  %vm825_vm4 = vcmp.gt.f32.partialorder %v821_v13, 0.0  ;;  %v832_v19 = vsel %vm824_vm3, %v820_v56, %v828_v14 }
 0x120   : > { %v833_v18 = vsel %vm825_vm4, %v821_v13, %v829_v15 }
 0x121   : > { %1495 = vmatprep.subr.msk.mxu1 %vm839_vm2, %v833_v18 }
 0x122   : > { %1496 = vmatpush1.msk.msra.mxu1 %vm839_vm2, %v832_v19 }
 0x123   : > { %876 = vmatprep.subr.mxu1 %v831_v20 }
 0x124   : > { %877 = vmatpush1.msra.mxu1 %v830_v22 }
 0x125   : > { %1497 = vmatmul.mubr.msk.f32.vlgmr.msra.gmra.mxu1 %vm835_vm7, %v834_v21  ;;  %1499 = vmatprep.subr.msk.mxu1 %vm839_vm2, %v833_v18 }
 0x126   : > { %1500 = vmatpush1.msk.msra.mxu1 %vm839_vm2, %v832_v19  ;;  %986 = vmatprep.mubr.f32.mxu1 %v1546_v46 }
 0x127   : > { %952 = vmatprep.subr.mxu1 %v831_v20 }
 0x128   : > { %953 = vmatpush1.msra.mxu1 %v830_v22 }
 0x129   : > { %1501 = vmatmul.mubr.msk.f32.vlgmr.msra.gmra.mxu1 %vm835_vm7, %v1498_v23  ;;  %1017 = vmatprep.subr.mxu1 %v1546_v46 }
 0x12a   : > { %1018 = vmatpush1.msra.mxu1 %v2118_v24 }
 0x12b   : > { %1019 = vmatprep.subr.mxu1 %v1546_v46 }
 0x12c   : > { %1020 = vmatpush1.msra.mxu1 %v2124_v25 }
 0x12d   : > { %1021 = vmatprep.subr.mxu1 %v1546_v46 }
 0x12e   : > { %1022 = vmatpush1.msra.mxu1 %v2131_v26 }
 0x12f   : > { %1023 = vmatprep.subr.mxu1 %v1546_v46 }
 0x130   : > { %1024 = vmatpush1.msra.mxu1 %v2138_v27 }
 0x131   : > { %1025 = vmatprep.subr.mxu1 %v1546_v46 }
 0x132   : > { %1026 = vmatpush1.msra.mxu1 %v2145_v28 }
 0x133   : > { %1027 = vmatprep.subr.mxu1 %v1546_v46 }
 0x134   : > { %1028 = vmatpush1.msra.mxu1 %v2152_v29 }
 0x135   : > { %1029 = vmatprep.subr.mxu1 %v1546_v46 }
 0x136   : > { %1030 = vmatpush1.msra.mxu1 %v2159_v30 }
 0x137   : > { %1031 = vmatprep.subr.mxu1 %v1546_v46 }
 0x138   : > { %1032 = vmatpush1.msra.mxu1 %v2166_v31 }
 0x139   : > { %1033 = vmatprep.subr.mxu1 %v1546_v46 }
 0x13a   : > { %1034 = vmatpush1.msra.mxu1 %v2173_v32 }
 0x13b   : > { %1035 = vmatprep.subr.mxu1 %v1546_v46 }
 0x13c   : > { %1036 = vmatpush1.msra.mxu1 %v2180_v33 }
 0x13d   : > { %1037 = vmatprep.subr.mxu1 %v1546_v46 }
 0x13e   : > { %1038 = vmatpush1.msra.mxu1 %v2187_v34 }
 0x13f   : > { %1039 = vmatprep.subr.mxu1 %v1546_v46 }
 0x140   : > { %1040 = vmatpush1.msra.mxu1 %v2194_v35 }
 0x141   : > { %1041 = vmatprep.subr.mxu1 %v1546_v46 }
 0x142   : > { %1042 = vmatpush1.msra.mxu1 %v2201_v36 }
 0x143   : > { %1043 = vmatprep.subr.mxu1 %v1546_v46 }
 0x144   : > { %1044 = vmatpush1.msra.mxu1 %v2208_v37 }
 0x145   : > { %1045 = vmatprep.subr.mxu1 %v1546_v46 }
 0x146   : > { %1046 = vmatpush1.msra.mxu1 %v2215_v38 }
 0x147   : > { %1047 = vmatprep.subr.mxu1 %v1546_v46 }
 0x148   : > { %1048 = vmatpush1.msra.mxu1 %v2222_v39 }
 0x149   : > { %1073 = vmatprep.subr.mxu1 %v1546_v46 }
 0x14a   : > { %1074 = vmatpush2.msra.mxu1 %v2229_v40 }
 0x14b   : > { %1075 = vmatprep.subr.mxu1 %v1546_v46 }
 0x14c   : > { %1076 = vmatpush2.msra.mxu1 %v2236_v41 }
 0x14d   : > { %1077 = vmatprep.subr.mxu1 %v1546_v46 }
 0x14e   : > { %1078 = vmatpush2.msra.mxu1 %v2245_v42 }
 0x14f   : > { %1079 = vmatprep.subr.mxu1 %v1546_v46 }
 0x150   : > { %1080 = vmatpush2.msra.mxu1 %v2259_v44 }
 0x151   : > { %1182 = vmatprep.subr.mxu1 %v1546_v46 }
 0x1e5   : > { %v912_v47 = vpop.f32.mrf.mxu1 }
 0x1e7   : > { %v914_v48 = vpop.f32.mrf.mxu1 }
 0x1e8   : > { %1502 = vmatprep.mubr.msk.f32.mxu1 %vm1013_vm8, %v914_v48  ;;  %1523 = vmatprep.mubr.msk.f32.mxu0 %vm1013_vm8, %v914_v48 }
 0x1e9   : > { %1082 = vmatmul.mubr.f32.vlgmr.msra.gmra.mxu1 %v912_v47  ;;  %1173 = vmatmul.mubr.f32.vlgmr.msra.gmra.mxu0 %v912_v47 }
 0x1ea   : > { %1183 = vmatpush1.msra.mxu1 %v2118_v24  ;;  %1253 = vmatpush1.msra.mxu0 %v1978_v58  ;;  %v988_v58 = vpop.f32.mrf.mxu1 }
 0x1eb   : > { %1184 = vmatprep.subr.mxu1 %v1546_v46  ;;  %1254 = vmatprep.subr.mxu0 %v1546_v46 }
 0x1ec   : > { %1185 = vmatpush1.msra.mxu1 %v2124_v25  ;;  %1255 = vmatpush1.msra.mxu0 %v1985_v59  ;;  %v990_v59 = vpop.f32.mrf.mxu1 }
 0x1ed   : > { %1186 = vmatprep.subr.mxu1 %v1546_v46  ;;  %1256 = vmatprep.subr.mxu0 %v1546_v46 }
 0x1ee   : > { %1187 = vmatpush1.msra.mxu1 %v2131_v26  ;;  %1257 = vmatpush1.msra.mxu0 %v1992_v60 }
 0x1ef   : > { %1188 = vmatprep.subr.mxu1 %v1546_v46  ;;  %1258 = vmatprep.subr.mxu0 %v1546_v46 }
 0x1f0   : > { %1189 = vmatpush1.msra.mxu1 %v2138_v27  ;;  %1259 = vmatpush1.msra.mxu0 %v1999_v61 }
 0x1f1   : > { %1190 = vmatprep.subr.mxu1 %v1546_v46  ;;  %1260 = vmatprep.subr.mxu0 %v1546_v46 }
 0x1f2   : > { %1191 = vmatpush1.msra.mxu1 %v2145_v28  ;;  %1261 = vmatpush1.msra.mxu0 %v2006_v62 }
 0x1f3   : > { %1192 = vmatprep.subr.mxu1 %v1546_v46  ;;  %1262 = vmatprep.subr.mxu0 %v1546_v46 }
 0x1f4   : > { %1193 = vmatpush1.msra.mxu1 %v2152_v29  ;;  %1263 = vmatpush1.msra.mxu0 %v2013_v63 }
 0x1f5   : > { %1194 = vmatprep.subr.mxu1 %v1546_v46  ;;  %1264 = vmatprep.subr.mxu0 %v1546_v46 }
 0x1f6   : > { %1195 = vmatpush1.msra.mxu1 %v2159_v30  ;;  %1265 = vmatpush1.msra.mxu0 %v2020_v0 }
 0x1f7   : > { %1196 = vmatprep.subr.mxu1 %v1546_v46  ;;  %1266 = vmatprep.subr.mxu0 %v1546_v46 }
 0x1f8   : > { %1197 = vmatpush1.msra.mxu1 %v2166_v31  ;;  %1267 = vmatpush1.msra.mxu0 %v2027_v1 }
 0x1f9   : > { %1198 = vmatprep.subr.mxu1 %v1546_v46  ;;  %1268 = vmatprep.subr.mxu0 %v1546_v46 }
 0x1fa   : > { %1199 = vmatpush1.msra.mxu1 %v2173_v32  ;;  %1269 = vmatpush1.msra.mxu0 %v2034_v2 }
 0x1fb   : > { %1200 = vmatprep.subr.mxu1 %v1546_v46  ;;  %1270 = vmatprep.subr.mxu0 %v1546_v46 }
 0x1fc   : > { %1201 = vmatpush1.msra.mxu1 %v2180_v33  ;;  %1271 = vmatpush1.msra.mxu0 %v2041_v3 }
 0x1fd   : > { %1202 = vmatprep.subr.mxu1 %v1546_v46  ;;  %1272 = vmatprep.subr.mxu0 %v1546_v46 }
 0x1fe   : > { %1203 = vmatpush1.msra.mxu1 %v2187_v34  ;;  %1273 = vmatpush1.msra.mxu0 %v2048_v4 }
 0x1ff   : > { %1204 = vmatprep.subr.mxu1 %v1546_v46  ;;  %1274 = vmatprep.subr.mxu0 %v1546_v46 }
 0x200   : > { %1205 = vmatpush1.msra.mxu1 %v2194_v35  ;;  %1275 = vmatpush1.msra.mxu0 %v2055_v5 }
 0x201   : > { %1206 = vmatprep.subr.mxu1 %v1546_v46  ;;  %1276 = vmatprep.subr.mxu0 %v1546_v46 }
 0x202   : > { %1207 = vmatpush1.msra.mxu1 %v2201_v36  ;;  %1277 = vmatpush1.msra.mxu0 %v2062_v6 }
 0x203   : > { %1208 = vmatprep.subr.mxu1 %v1546_v46  ;;  %1278 = vmatprep.subr.mxu0 %v1546_v46 }
 0x204   : > { %1209 = vmatpush1.msra.mxu1 %v2208_v37  ;;  %1279 = vmatpush1.msra.mxu0 %v2069_v7 }
 0x205   : > { %1210 = vmatprep.subr.mxu1 %v1546_v46  ;;  %1280 = vmatprep.subr.mxu0 %v1546_v46 }
 0x206   : > { %1211 = vmatpush1.msra.mxu1 %v2215_v38  ;;  %1281 = vmatpush1.msra.mxu0 %v2076_v8 }
 0x207   : > { %1212 = vmatprep.subr.mxu1 %v1546_v46  ;;  %1282 = vmatprep.subr.mxu0 %v1546_v46 }
 0x208   : > { %1213 = vmatpush1.msra.mxu1 %v2222_v39  ;;  %1283 = vmatpush1.msra.mxu0 %v2083_v9 }
 0x209   : > { %1238 = vmatprep.subr.mxu1 %v1546_v46  ;;  %1308 = vmatprep.subr.mxu0 %v1546_v46 }
 0x20a   : > { %1239 = vmatpush2.msra.mxu1 %v2229_v40  ;;  %1309 = vmatpush2.msra.mxu0 %v2090_v10 }
 0x20b   : > { %1240 = vmatprep.subr.mxu1 %v1546_v46  ;;  %1310 = vmatprep.subr.mxu0 %v1546_v46 }
 0x20c   : > { %1241 = vmatpush2.msra.mxu1 %v2236_v41  ;;  %1311 = vmatpush2.msra.mxu0 %v2097_v11 }
 0x20d   : > { %1242 = vmatprep.subr.mxu1 %v1546_v46  ;;  %1312 = vmatprep.subr.mxu0 %v1546_v46 }
 0x20e   : > { %1243 = vmatpush2.msra.mxu1 %v2245_v42  ;;  %1313 = vmatpush2.msra.mxu0 %v2250_v43 }
 0x20f   : > { %1244 = vmatprep.subr.mxu1 %v1546_v46  ;;  %1314 = vmatprep.subr.mxu0 %v1546_v46 }
 0x210   : > { %1245 = vmatpush2.msra.mxu1 %v2259_v44  ;;  %1524 = vmatprep.mubr.msk.f32.mxu1 %vm1013_vm8, %v990_v59 }
 0x211   : > { %1315 = vmatpush2.msra.mxu0 %v2264_v45  ;;  %1525 = vmatprep.mubr.msk.f32.mxu0 %vm1013_vm8, %v990_v59 }
 0x212   : > { %1247 = vmatmul.mubr.f32.vlgmr.msra.gmra.mxu1 %v988_v58  ;;  %1317 = vmatmul.mubr.f32.vlgmr.msra.gmra.mxu0 %v988_v58 }
 0x2a9   : > { %v1083_v60 = vpop.f32.mrf.mxu1  ;;  %v1174_v61 = vpop.f32.mrf.mxu0 }
 0x2aa   : > { %v1178_v2 = vmax.f32 %v1083_v60, %v1174_v61 }
 0x2ab   : > { %v1085_v62 = vpop.f32.mrf.mxu1  ;;  %v1176_v63 = vpop.f32.mrf.mxu0 }
 0x2d2   : > { %v1248_v0 = vpop.f32.mrf.mxu1  ;;  %v1318_v1 = vpop.f32.mrf.mxu0 }
 0x2d3   : > { %v1322_v3 = vmax.f32 %v1248_v0, %v1318_v1 }
 0x2d4   : > { %v1250_v46 = vpop.f32.mrf.mxu1  ;;  %v1320_v4 = vpop.f32.mrf.mxu0 }
 0x2d5   : > { %v1323_v5 = vmax.f32 %v1178_v2, %v1322_v3 }
 0x2d7   : > { %1325 = vst.msk [vmem:[%s222_s16] sm:$0x1f] %vm1324_vm9, %v1323_v5 }
 0x2d8 PF: > { %s15_s18 = sadd.s32 1, %s1544_s18  }
 0x2d9   : > { %p12_p4 = scmp.ge.s32.totalorder %s15_s18, 4  }
 0x2db   :  { %14 = sbr.rel (!%p12_p4) target bundleno = 1 (0x1), region = 76 }

</bundles_post_ra>
